<compile_context>
chip_gen: v7x
topology: tpu7x:2x2x1
jax: 0.10.0
libtpu: 0.0.40
codegen_flags: <defaults>
</compile_context>

<pallas_src>
import functools

import jax
import jax.numpy as jnp
from jax import lax
from jax.experimental import pallas as pl
from jax.experimental.pallas import tpu as pltpu


def _bilstm_dir_kernel(x_ref, w_in_ref, w_hh_ref, b_ref, h_out_ref, gx_ref):
    """One grid step = the full T-step scan of ONE LSTM direction.

    x_ref    : (T*Bp, E)    bf16, time-major (shared by both directions)
    w_in_ref : (E, 4*Hp)    bf16, gate order i,f,g,o; each gate lane-padded to Hp
    w_hh_ref : (Hp, 4*Hp)   bf16
    b_ref    : (1, 4*Hp)    f32  (b_ih + b_hh folded, lane-padded per gate)
    h_out_ref: (Bp, Hp)     f32, final hidden state of this direction
    gx_ref   : (T*Bp, 4*Hp) f32 VMEM scratch — hoisted input projection
    """
    Bp, Hp = h_out_ref.shape
    T = x_ref.shape[0] // Bp
    d = pl.program_id(0)          # 0 = forward, 1 = backward (time-reversed walk)

    # ---- Phase 1: hoist the input projection out of the recurrence.
    # One big MXU matmul over all T timesteps at once (M = T*Bp), plus bias.
    gx_ref[...] = (
        jnp.dot(x_ref[...], w_in_ref[...], preferred_element_type=jnp.float32)
        + b_ref[...])

    w_hh = w_hh_ref[...]          # resident in vregs/VMEM, reused every step

    # ---- Phase 2: sequential recurrence — only (Bp,Hp) x (Hp,4Hp) per step.
    def step(t, carry):
        h, c = carry                                           # (Bp, Hp) f32
        t_eff = jnp.where(d == 0, t, T - 1 - t)                # fwd: t, bwd: T-1-t
        row = pl.multiple_of(t_eff * Bp, Bp)                   # sublane-aligned
        gates = gx_ref[pl.ds(row, Bp), :] + jnp.dot(
            h.astype(jnp.bfloat16), w_hh, preferred_element_type=jnp.float32)
        # Hp is a multiple of 128 => every gate slice is lane-aligned (no XLU shifts).
        i = jax.nn.sigmoid(gates[:, 0 * Hp:1 * Hp])
        f = jax.nn.sigmoid(gates[:, 1 * Hp:2 * Hp])
        g = jnp.tanh(gates[:, 2 * Hp:3 * Hp])
        o = jax.nn.sigmoid(gates[:, 3 * Hp:4 * Hp])
        c = f * c + i * g
        h = o * jnp.tanh(c)
        return h, c

    zero = jnp.zeros((Bp, Hp), jnp.float32)
    h, _ = lax.fori_loop(0, T, step, (zero, zero), unroll=(T <= 16))
    h_out_ref[...] = h


def bilstm_fc_forward(embedded, params):
    """embedded: (B, T, E) f32.  Returns logits (B, 2)."""
    B, T, E = embedded.shape
    H = params["whh_f"].shape[1]              # whh_f: (4H, H)
    Bp = max(8, ((B + 7) // 8) * 8)           # pad batch to a sublane multiple
    Hp = ((H + 127) // 128) * 128             # pad hidden to a lane multiple

    # Time-major, batch-padded, flattened to (T*Bp, E); bf16 for the MXU.
    x = jnp.transpose(embedded, (1, 0, 2))                        # (T, B, E)
    x = jnp.pad(x, ((0, 0), (0, Bp - B), (0, 0)))                 # (T, Bp, E)
    x2d = x.reshape(T * Bp, E).astype(jnp.bfloat16)

    # Pre-transpose weights to (in, 4H) and zero-pad each gate's columns H -> Hp.
    def pad_gates(w_t, rows_p):
        rows = w_t.shape[0]
        w4 = w_t.reshape(rows, 4, H)
        w4 = jnp.pad(w4, ((0, rows_p - rows), (0, 0), (0, Hp - H)))
        return w4.reshape(rows_p, 4 * Hp)

    w_in_dirs = jnp.stack([pad_gates(params["wih_f"].T, E),
                           pad_gates(params["wih_b"].T, E)]).astype(jnp.bfloat16)
    w_hh_dirs = jnp.stack([pad_gates(params["whh_f"].T, Hp),
                           pad_gates(params["whh_b"].T, Hp)]).astype(jnp.bfloat16)
    b_dirs = jnp.stack([pad_gates(params["b_f"][None, :], 1),
                        pad_gates(params["b_b"][None, :], 1)])    # (2, 1, 4Hp) f32

    h_fin = pl.pallas_call(
        _bilstm_dir_kernel,
        out_shape=jax.ShapeDtypeStruct((2, Bp, Hp), jnp.float32),
        grid=(2,),
        in_specs=[
            pl.BlockSpec((T * Bp, E), lambda d: (0, 0)),               # x, shared
            pl.BlockSpec((None, E, 4 * Hp), lambda d: (d, 0, 0)),      # W_ih (dir d)
            pl.BlockSpec((None, Hp, 4 * Hp), lambda d: (d, 0, 0)),     # W_hh (dir d)
            pl.BlockSpec((None, 1, 4 * Hp), lambda d: (d, 0, 0)),      # bias (dir d)
        ],
        out_specs=pl.BlockSpec((None, Bp, Hp), lambda d: (d, 0, 0)),   # final h (dir d)
        scratch_shapes=[pltpu.VMEM((T * Bp, 4 * Hp), jnp.float32)],
        compiler_params=pltpu.CompilerParams(
            dimension_semantics=("parallel",)),   # v7x: one direction per TensorCore
    )(x2d, w_in_dirs, w_hh_dirs, b_dirs)

    # hidden = cat(h_fwd_final, h_bwd_final); tiny 2-wide FC stays in the wrapper
    # (lane-sparse output would force masked partial stores inside the kernel).
    hidden = jnp.concatenate([h_fin[0, :B, :H], h_fin[1, :B, :H]], axis=1)  # (B, 2H)
    return hidden @ params["wfc"].T + params["bfc"]


def init_params(key, vocab_size, embedding_dim, hidden_dim):
    V, E, H = vocab_size, embedding_dim, hidden_dim
    ks = jax.random.split(key, 12)
    # Embedding: xavier_uniform_
    bound_emb = jnp.sqrt(6.0 / (V + E))
    emb = jax.random.uniform(ks[0], (V, E), jnp.float32, -bound_emb, bound_emb)
    # LSTM / Linear: uniform(-1/sqrt(H), 1/sqrt(H)) like PyTorch defaults
    k = 1.0 / jnp.sqrt(jnp.float32(H))
    u = lambda kk, shape: jax.random.uniform(kk, shape, jnp.float32, -k, k)
    params = {
        "emb": emb,
        "wih_f": u(ks[1], (4 * H, E)),
        "whh_f": u(ks[2], (4 * H, H)),
        # PyTorch has separate b_ih and b_hh; they are always summed -> fold into one.
        "b_f": u(ks[3], (4 * H,)) + u(ks[4], (4 * H,)),
        "wih_b": u(ks[5], (4 * H, E)),
        "whh_b": u(ks[6], (4 * H, H)),
        "b_b": u(ks[7], (4 * H,)) + u(ks[8], (4 * H,)),
        "wfc": u(ks[9], (2, 2 * H)),
        "bfc": u(ks[10], (2,)),
    }
    return params


def lstm_model_forward(text, params):
    """text: (B, T) int32 token ids.  Returns logits (B, 2)."""
    embedded = jnp.take(params["emb"], text, axis=0)   # (B, T, E) — glue gather
    return bilstm_fc_forward(embedded, params)


if __name__ == "__main__":
    VOCAB, E, H = 50, 32, 32
    B, T = 2, 8

    key = jax.random.PRNGKey(0)
    pkey, tkey = jax.random.split(key)
    params = init_params(pkey, VOCAB, E, H)
    text = jax.random.randint(tkey, (B, T), 0, VOCAB, dtype=jnp.int32)

    logits = jax.jit(functools.partial(lstm_model_forward, params=params))(text)
    jax.block_until_ready(logits)
    assert logits.shape == (B, 2) and logits.dtype == jnp.float32
    assert bool(jnp.all(jnp.isfinite(logits)))
    print("KERNEL_OK")
</pallas_src>

<mosaic_0001>
module attributes {stable_mosaic.version = 11 : i64} {
  func.func @_bilstm_dir_kernel(%arg0: i32, %arg1: memref<64x32xbf16, #tpu.memory_space<vmem>>, %arg2: memref<1x32x512xbf16, #tpu.memory_space<vmem>>, %arg3: memref<1x128x512xbf16, #tpu.memory_space<vmem>>, %arg4: memref<1x1x512xf32, #tpu.memory_space<vmem>>, %arg5: memref<1x8x128xf32, #tpu.memory_space<vmem>>, %arg6: memref<64x512xf32, #tpu.memory_space<vmem>>) attributes {dimension_semantics = [#tpu.dimension_semantics<parallel>], iteration_bounds = array<i64: 2>, scalar_prefetch = 0 : i64, scratch_operands = 1 : i64, tpu.core_type = #tpu.core_type<tc>, window_params = [{pipeline_mode = #tpu.pipeline_mode<synchronous>, transform_indices = @transform_0, window_bounds = array<i64: 64, 32>}, {transform_indices = @transform_1, window_bounds = array<i64: 1, 32, 512>}, {transform_indices = @transform_2, window_bounds = array<i64: 1, 128, 512>}, {transform_indices = @transform_3, window_bounds = array<i64: 1, 1, 512>}, {transform_indices = @transform_4, window_bounds = array<i64: 1, 8, 128>}]} {
    %c0 = arith.constant 0 : index
    %c0_0 = arith.constant 0 : index
    %0 = vector.load %arg1[%c0, %c0_0] : memref<64x32xbf16, #tpu.memory_space<vmem>>, vector<64x32xbf16>
    %c0_1 = arith.constant 0 : index
    %c0_2 = arith.constant 0 : index
    %c0_3 = arith.constant 0 : index
    %1 = vector.load %arg2[%c0_1, %c0_2, %c0_3] : memref<1x32x512xbf16, #tpu.memory_space<vmem>>, vector<1x32x512xbf16>
    %2 = vector.shape_cast %1 : vector<1x32x512xbf16> to vector<32x512xbf16>
    %cst = arith.constant dense<0.000000e+00> : vector<64x512xf32>
    %3 = tpu.matmul %0, %2, %cst {dimension_numbers = #tpu.dot_dimension_numbers<[1], [0], [0], [1], [0, 0, 1, 1], [], []>} : vector<64x32xbf16>, vector<32x512xbf16>, vector<64x512xf32> -> vector<64x512xf32>
    %c0_4 = arith.constant 0 : index
    %c0_5 = arith.constant 0 : index
    %c0_6 = arith.constant 0 : index
    %4 = vector.load %arg4[%c0_4, %c0_5, %c0_6] : memref<1x1x512xf32, #tpu.memory_space<vmem>>, vector<1x1x512xf32>
    %5 = vector.shape_cast %4 : vector<1x1x512xf32> to vector<1x512xf32>
    %6 = vector.broadcast %5 : vector<1x512xf32> to vector<64x512xf32>
    %7 = arith.addf %3, %6 : vector<64x512xf32>
    %c0_7 = arith.constant 0 : index
    %c0_8 = arith.constant 0 : index
    %8 = vector.load %arg6[%c0_7, %c0_8] : memref<64x512xf32, #tpu.memory_space<vmem>>, vector<64x512xf32>
    tpu.vector_store %arg6[%c0_7, %c0_8], %7 {strides = array<i32>} : memref<64x512xf32, #tpu.memory_space<vmem>>, vector<64x512xf32>,
    %c0_9 = arith.constant 0 : index
    %c0_10 = arith.constant 0 : index
    %c0_11 = arith.constant 0 : index
    %9 = vector.load %arg3[%c0_9, %c0_10, %c0_11] : memref<1x128x512xbf16, #tpu.memory_space<vmem>>, vector<1x128x512xbf16>
    %10 = vector.shape_cast %9 : vector<1x128x512xbf16> to vector<128x512xbf16>
    %cst_12 = arith.constant 0.000000e+00 : f32
    %11 = vector.broadcast %cst_12 : f32 to vector<8x128xf32>
    %c0_i32 = arith.constant 0 : i32
    %c0_i32_13 = arith.constant 0 : i32
    %12 = arith.cmpi eq, %arg0, %c0_i32_13 : i32
    %c7_i32 = arith.constant 7 : i32
    %13 = arith.subi %c7_i32, %c0_i32 : i32
    %14 = arith.select %12, %c0_i32, %13 : i32
    %c8_i32 = arith.constant 8 : i32
    %15 = arith.muli %14, %c8_i32 : i32
    %16 = tpu.assume_multiple %15, 8 : i32
    %17 = arith.index_cast %16 : i32 to index
    %c0_14 = arith.constant 0 : index
    %18 = vector.load %arg6[%17, %c0_14] : memref<64x512xf32, #tpu.memory_space<vmem>>, vector<8x512xf32>
    %19 = arith.truncf %11 : vector<8x128xf32> to vector<8x128xbf16>
    %cst_15 = arith.constant dense<0.000000e+00> : vector<8x512xf32>
    %20 = tpu.matmul %19, %10, %cst_15 {dimension_numbers = #tpu.dot_dimension_numbers<[1], [0], [0], [1], [0, 0, 1, 1], [], []>} : vector<8x128xbf16>, vector<128x512xbf16>, vector<8x512xf32> -> vector<8x512xf32>
    %21 = arith.addf %18, %20 : vector<8x512xf32>
    %22 = vector.extract_strided_slice %21 {offsets = [0, 0], sizes = [8, 128], strides = [1, 1]} : vector<8x512xf32> to vector<8x128xf32>
    %23 = arith.negf %22 : vector<8x128xf32>
    %24 = math.exp %23 : vector<8x128xf32>
    %cst_16 = arith.constant 1.000000e+00 : f32
    %25 = vector.broadcast %cst_16 : f32 to vector<8x128xf32>
    %26 = arith.addf %25, %24 : vector<8x128xf32>
    %27 = arith.divf %25, %26 : vector<8x128xf32>
    %28 = vector.extract_strided_slice %21 {offsets = [0, 128], sizes = [8, 128], strides = [1, 1]} : vector<8x512xf32> to vector<8x128xf32>
    %29 = arith.negf %28 : vector<8x128xf32>
    %30 = math.exp %29 : vector<8x128xf32>
    %cst_17 = arith.constant 1.000000e+00 : f32
    %31 = vector.broadcast %cst_17 : f32 to vector<8x128xf32>
    %32 = arith.addf %31, %30 : vector<8x128xf32>
    %33 = arith.divf %31, %32 : vector<8x128xf32>
    %34 = vector.extract_strided_slice %21 {offsets = [0, 256], sizes = [8, 128], strides = [1, 1]} : vector<8x512xf32> to vector<8x128xf32>
    %35 = math.tanh %34 : vector<8x128xf32>
    %36 = vector.extract_strided_slice %21 {offsets = [0, 384], sizes = [8, 128], strides = [1, 1]} : vector<8x512xf32> to vector<8x128xf32>
    %37 = arith.negf %36 : vector<8x128xf32>
    %38 = math.exp %37 : vector<8x128xf32>
    %cst_18 = arith.constant 1.000000e+00 : f32
    %39 = vector.broadcast %cst_18 : f32 to vector<8x128xf32>
    %40 = arith.addf %39, %38 : vector<8x128xf32>
    %41 = arith.divf %39, %40 : vector<8x128xf32>
    %42 = arith.mulf %33, %11 : vector<8x128xf32>
    %43 = arith.mulf %27, %35 : vector<8x128xf32>
    %44 = arith.addf %42, %43 : vector<8x128xf32>
    %45 = math.tanh %44 : vector<8x128xf32>
    %46 = arith.mulf %41, %45 : vector<8x128xf32>
    %c1_i32 = arith.constant 1 : i32
    %c0_i32_19 = arith.constant 0 : i32
    %47 = arith.cmpi eq, %arg0, %c0_i32_19 : i32
    %c7_i32_20 = arith.constant 7 : i32
    %48 = arith.subi %c7_i32_20, %c1_i32 : i32
    %49 = arith.select %47, %c1_i32, %48 : i32
    %c8_i32_21 = arith.constant 8 : i32
    %50 = arith.muli %49, %c8_i32_21 : i32
    %51 = tpu.assume_multiple %50, 8 : i32
    %52 = arith.index_cast %51 : i32 to index
    %c0_22 = arith.constant 0 : index
    %53 = vector.load %arg6[%52, %c0_22] : memref<64x512xf32, #tpu.memory_space<vmem>>, vector<8x512xf32>
    %54 = arith.truncf %46 : vector<8x128xf32> to vector<8x128xbf16>
    %cst_23 = arith.constant dense<0.000000e+00> : vector<8x512xf32>
    %55 = tpu.matmul %54, %10, %cst_23 {dimension_numbers = #tpu.dot_dimension_numbers<[1], [0], [0], [1], [0, 0, 1, 1], [], []>} : vector<8x128xbf16>, vector<128x512xbf16>, vector<8x512xf32> -> vector<8x512xf32>
    %56 = arith.addf %53, %55 : vector<8x512xf32>
    %57 = vector.extract_strided_slice %56 {offsets = [0, 0], sizes = [8, 128], strides = [1, 1]} : vector<8x512xf32> to vector<8x128xf32>
    %58 = arith.negf %57 : vector<8x128xf32>
    %59 = math.exp %58 : vector<8x128xf32>
    %cst_24 = arith.constant 1.000000e+00 : f32
    %60 = vector.broadcast %cst_24 : f32 to vector<8x128xf32>
    %61 = arith.addf %60, %59 : vector<8x128xf32>
    %62 = arith.divf %60, %61 : vector<8x128xf32>
    %63 = vector.extract_strided_slice %56 {offsets = [0, 128], sizes = [8, 128], strides = [1, 1]} : vector<8x512xf32> to vector<8x128xf32>
    %64 = arith.negf %63 : vector<8x128xf32>
    %65 = math.exp %64 : vector<8x128xf32>
    %cst_25 = arith.constant 1.000000e+00 : f32
    %66 = vector.broadcast %cst_25 : f32 to vector<8x128xf32>
    %67 = arith.addf %66, %65 : vector<8x128xf32>
    %68 = arith.divf %66, %67 : vector<8x128xf32>
    %69 = vector.extract_strided_slice %56 {offsets = [0, 256], sizes = [8, 128], strides = [1, 1]} : vector<8x512xf32> to vector<8x128xf32>
    %70 = math.tanh %69 : vector<8x128xf32>
    %71 = vector.extract_strided_slice %56 {offsets = [0, 384], sizes = [8, 128], strides = [1, 1]} : vector<8x512xf32> to vector<8x128xf32>
    %72 = arith.negf %71 : vector<8x128xf32>
    %73 = math.exp %72 : vector<8x128xf32>
    %cst_26 = arith.constant 1.000000e+00 : f32
    %74 = vector.broadcast %cst_26 : f32 to vector<8x128xf32>
    %75 = arith.addf %74, %73 : vector<8x128xf32>
    %76 = arith.divf %74, %75 : vector<8x128xf32>
    %77 = arith.mulf %68, %44 : vector<8x128xf32>
    %78 = arith.mulf %62, %70 : vector<8x128xf32>
    %79 = arith.addf %77, %78 : vector<8x128xf32>
    %80 = math.tanh %79 : vector<8x128xf32>
    %81 = arith.mulf %76, %80 : vector<8x128xf32>
    %c2_i32 = arith.constant 2 : i32
    %c0_i32_27 = arith.constant 0 : i32
    %82 = arith.cmpi eq, %arg0, %c0_i32_27 : i32
    %c7_i32_28 = arith.constant 7 : i32
    %83 = arith.subi %c7_i32_28, %c2_i32 : i32
    %84 = arith.select %82, %c2_i32, %83 : i32
    %c8_i32_29 = arith.constant 8 : i32
    %85 = arith.muli %84, %c8_i32_29 : i32
    %86 = tpu.assume_multiple %85, 8 : i32
    %87 = arith.index_cast %86 : i32 to index
    %c0_30 = arith.constant 0 : index
    %88 = vector.load %arg6[%87, %c0_30] : memref<64x512xf32, #tpu.memory_space<vmem>>, vector<8x512xf32>
    %89 = arith.truncf %81 : vector<8x128xf32> to vector<8x128xbf16>
    %cst_31 = arith.constant dense<0.000000e+00> : vector<8x512xf32>
    %90 = tpu.matmul %89, %10, %cst_31 {dimension_numbers = #tpu.dot_dimension_numbers<[1], [0], [0], [1], [0, 0, 1, 1], [], []>} : vector<8x128xbf16>, vector<128x512xbf16>, vector<8x512xf32> -> vector<8x512xf32>
    %91 = arith.addf %88, %90 : vector<8x512xf32>
    %92 = vector.extract_strided_slice %91 {offsets = [0, 0], sizes = [8, 128], strides = [1, 1]} : vector<8x512xf32> to vector<8x128xf32>
    %93 = arith.negf %92 : vector<8x128xf32>
    %94 = math.exp %93 : vector<8x128xf32>
    %cst_32 = arith.constant 1.000000e+00 : f32
    %95 = vector.broadcast %cst_32 : f32 to vector<8x128xf32>
    %96 = arith.addf %95, %94 : vector<8x128xf32>
    %97 = arith.divf %95, %96 : vector<8x128xf32>
    %98 = vector.extract_strided_slice %91 {offsets = [0, 128], sizes = [8, 128], strides = [1, 1]} : vector<8x512xf32> to vector<8x128xf32>
    %99 = arith.negf %98 : vector<8x128xf32>
    %100 = math.exp %99 : vector<8x128xf32>
    %cst_33 = arith.constant 1.000000e+00 : f32
    %101 = vector.broadcast %cst_33 : f32 to vector<8x128xf32>
    %102 = arith.addf %101, %100 : vector<8x128xf32>
    %103 = arith.divf %101, %102 : vector<8x128xf32>
    %104 = vector.extract_strided_slice %91 {offsets = [0, 256], sizes = [8, 128], strides = [1, 1]} : vector<8x512xf32> to vector<8x128xf32>
    %105 = math.tanh %104 : vector<8x128xf32>
    %106 = vector.extract_strided_slice %91 {offsets = [0, 384], sizes = [8, 128], strides = [1, 1]} : vector<8x512xf32> to vector<8x128xf32>
    %107 = arith.negf %106 : vector<8x128xf32>
    %108 = math.exp %107 : vector<8x128xf32>
    %cst_34 = arith.constant 1.000000e+00 : f32
    %109 = vector.broadcast %cst_34 : f32 to vector<8x128xf32>
    %110 = arith.addf %109, %108 : vector<8x128xf32>
    %111 = arith.divf %109, %110 : vector<8x128xf32>
    %112 = arith.mulf %103, %79 : vector<8x128xf32>
    %113 = arith.mulf %97, %105 : vector<8x128xf32>
    %114 = arith.addf %112, %113 : vector<8x128xf32>
    %115 = math.tanh %114 : vector<8x128xf32>
    %116 = arith.mulf %111, %115 : vector<8x128xf32>
    %c3_i32 = arith.constant 3 : i32
    %c0_i32_35 = arith.constant 0 : i32
    %117 = arith.cmpi eq, %arg0, %c0_i32_35 : i32
    %c7_i32_36 = arith.constant 7 : i32
    %118 = arith.subi %c7_i32_36, %c3_i32 : i32
    %119 = arith.select %117, %c3_i32, %118 : i32
    %c8_i32_37 = arith.constant 8 : i32
    %120 = arith.muli %119, %c8_i32_37 : i32
    %121 = tpu.assume_multiple %120, 8 : i32
    %122 = arith.index_cast %121 : i32 to index
    %c0_38 = arith.constant 0 : index
    %123 = vector.load %arg6[%122, %c0_38] : memref<64x512xf32, #tpu.memory_space<vmem>>, vector<8x512xf32>
    %124 = arith.truncf %116 : vector<8x128xf32> to vector<8x128xbf16>
    %cst_39 = arith.constant dense<0.000000e+00> : vector<8x512xf32>
    %125 = tpu.matmul %124, %10, %cst_39 {dimension_numbers = #tpu.dot_dimension_numbers<[1], [0], [0], [1], [0, 0, 1, 1], [], []>} : vector<8x128xbf16>, vector<128x512xbf16>, vector<8x512xf32> -> vector<8x512xf32>
    %126 = arith.addf %123, %125 : vector<8x512xf32>
    %127 = vector.extract_strided_slice %126 {offsets = [0, 0], sizes = [8, 128], strides = [1, 1]} : vector<8x512xf32> to vector<8x128xf32>
    %128 = arith.negf %127 : vector<8x128xf32>
    %129 = math.exp %128 : vector<8x128xf32>
    %cst_40 = arith.constant 1.000000e+00 : f32
    %130 = vector.broadcast %cst_40 : f32 to vector<8x128xf32>
    %131 = arith.addf %130, %129 : vector<8x128xf32>
    %132 = arith.divf %130, %131 : vector<8x128xf32>
    %133 = vector.extract_strided_slice %126 {offsets = [0, 128], sizes = [8, 128], strides = [1, 1]} : vector<8x512xf32> to vector<8x128xf32>
    %134 = arith.negf %133 : vector<8x128xf32>
    %135 = math.exp %134 : vector<8x128xf32>
    %cst_41 = arith.constant 1.000000e+00 : f32
    %136 = vector.broadcast %cst_41 : f32 to vector<8x128xf32>
    %137 = arith.addf %136, %135 : vector<8x128xf32>
    %138 = arith.divf %136, %137 : vector<8x128xf32>
    %139 = vector.extract_strided_slice %126 {offsets = [0, 256], sizes = [8, 128], strides = [1, 1]} : vector<8x512xf32> to vector<8x128xf32>
    %140 = math.tanh %139 : vector<8x128xf32>
    %141 = vector.extract_strided_slice %126 {offsets = [0, 384], sizes = [8, 128], strides = [1, 1]} : vector<8x512xf32> to vector<8x128xf32>
    %142 = arith.negf %141 : vector<8x128xf32>
    %143 = math.exp %142 : vector<8x128xf32>
    %cst_42 = arith.constant 1.000000e+00 : f32
    %144 = vector.broadcast %cst_42 : f32 to vector<8x128xf32>
    %145 = arith.addf %144, %143 : vector<8x128xf32>
    %146 = arith.divf %144, %145 : vector<8x128xf32>
    %147 = arith.mulf %138, %114 : vector<8x128xf32>
    %148 = arith.mulf %132, %140 : vector<8x128xf32>
    %149 = arith.addf %147, %148 : vector<8x128xf32>
    %150 = math.tanh %149 : vector<8x128xf32>
    %151 = arith.mulf %146, %150 : vector<8x128xf32>
    %c4_i32 = arith.constant 4 : i32
    %c0_i32_43 = arith.constant 0 : i32
    %152 = arith.cmpi eq, %arg0, %c0_i32_43 : i32
    %c7_i32_44 = arith.constant 7 : i32
    %153 = arith.subi %c7_i32_44, %c4_i32 : i32
    %154 = arith.select %152, %c4_i32, %153 : i32
    %c8_i32_45 = arith.constant 8 : i32
    %155 = arith.muli %154, %c8_i32_45 : i32
    %156 = tpu.assume_multiple %155, 8 : i32
    %157 = arith.index_cast %156 : i32 to index
    %c0_46 = arith.constant 0 : index
    %158 = vector.load %arg6[%157, %c0_46] : memref<64x512xf32, #tpu.memory_space<vmem>>, vector<8x512xf32>
    %159 = arith.truncf %151 : vector<8x128xf32> to vector<8x128xbf16>
    %cst_47 = arith.constant dense<0.000000e+00> : vector<8x512xf32>
    %160 = tpu.matmul %159, %10, %cst_47 {dimension_numbers = #tpu.dot_dimension_numbers<[1], [0], [0], [1], [0, 0, 1, 1], [], []>} : vector<8x128xbf16>, vector<128x512xbf16>, vector<8x512xf32> -> vector<8x512xf32>
    %161 = arith.addf %158, %160 : vector<8x512xf32>
    %162 = vector.extract_strided_slice %161 {offsets = [0, 0], sizes = [8, 128], strides = [1, 1]} : vector<8x512xf32> to vector<8x128xf32>
    %163 = arith.negf %162 : vector<8x128xf32>
    %164 = math.exp %163 : vector<8x128xf32>
    %cst_48 = arith.constant 1.000000e+00 : f32
    %165 = vector.broadcast %cst_48 : f32 to vector<8x128xf32>
    %166 = arith.addf %165, %164 : vector<8x128xf32>
    %167 = arith.divf %165, %166 : vector<8x128xf32>
    %168 = vector.extract_strided_slice %161 {offsets = [0, 128], sizes = [8, 128], strides = [1, 1]} : vector<8x512xf32> to vector<8x128xf32>
    %169 = arith.negf %168 : vector<8x128xf32>
    %170 = math.exp %169 : vector<8x128xf32>
    %cst_49 = arith.constant 1.000000e+00 : f32
    %171 = vector.broadcast %cst_49 : f32 to vector<8x128xf32>
    %172 = arith.addf %171, %170 : vector<8x128xf32>
    %173 = arith.divf %171, %172 : vector<8x128xf32>
    %174 = vector.extract_strided_slice %161 {offsets = [0, 256], sizes = [8, 128], strides = [1, 1]} : vector<8x512xf32> to vector<8x128xf32>
    %175 = math.tanh %174 : vector<8x128xf32>
    %176 = vector.extract_strided_slice %161 {offsets = [0, 384], sizes = [8, 128], strides = [1, 1]} : vector<8x512xf32> to vector<8x128xf32>
    %177 = arith.negf %176 : vector<8x128xf32>
    %178 = math.exp %177 : vector<8x128xf32>
    %cst_50 = arith.constant 1.000000e+00 : f32
    %179 = vector.broadcast %cst_50 : f32 to vector<8x128xf32>
    %180 = arith.addf %179, %178 : vector<8x128xf32>
    %181 = arith.divf %179, %180 : vector<8x128xf32>
    %182 = arith.mulf %173, %149 : vector<8x128xf32>
    %183 = arith.mulf %167, %175 : vector<8x128xf32>
    %184 = arith.addf %182, %183 : vector<8x128xf32>
    %185 = math.tanh %184 : vector<8x128xf32>
    %186 = arith.mulf %181, %185 : vector<8x128xf32>
    %c5_i32 = arith.constant 5 : i32
    %c0_i32_51 = arith.constant 0 : i32
    %187 = arith.cmpi eq, %arg0, %c0_i32_51 : i32
    %c7_i32_52 = arith.constant 7 : i32
    %188 = arith.subi %c7_i32_52, %c5_i32 : i32
    %189 = arith.select %187, %c5_i32, %188 : i32
    %c8_i32_53 = arith.constant 8 : i32
    %190 = arith.muli %189, %c8_i32_53 : i32
    %191 = tpu.assume_multiple %190, 8 : i32
    %192 = arith.index_cast %191 : i32 to index
    %c0_54 = arith.constant 0 : index
    %193 = vector.load %arg6[%192, %c0_54] : memref<64x512xf32, #tpu.memory_space<vmem>>, vector<8x512xf32>
    %194 = arith.truncf %186 : vector<8x128xf32> to vector<8x128xbf16>
    %cst_55 = arith.constant dense<0.000000e+00> : vector<8x512xf32>
    %195 = tpu.matmul %194, %10, %cst_55 {dimension_numbers = #tpu.dot_dimension_numbers<[1], [0], [0], [1], [0, 0, 1, 1], [], []>} : vector<8x128xbf16>, vector<128x512xbf16>, vector<8x512xf32> -> vector<8x512xf32>
    %196 = arith.addf %193, %195 : vector<8x512xf32>
    %197 = vector.extract_strided_slice %196 {offsets = [0, 0], sizes = [8, 128], strides = [1, 1]} : vector<8x512xf32> to vector<8x128xf32>
    %198 = arith.negf %197 : vector<8x128xf32>
    %199 = math.exp %198 : vector<8x128xf32>
    %cst_56 = arith.constant 1.000000e+00 : f32
    %200 = vector.broadcast %cst_56 : f32 to vector<8x128xf32>
    %201 = arith.addf %200, %199 : vector<8x128xf32>
    %202 = arith.divf %200, %201 : vector<8x128xf32>
    %203 = vector.extract_strided_slice %196 {offsets = [0, 128], sizes = [8, 128], strides = [1, 1]} : vector<8x512xf32> to vector<8x128xf32>
    %204 = arith.negf %203 : vector<8x128xf32>
    %205 = math.exp %204 : vector<8x128xf32>
    %cst_57 = arith.constant 1.000000e+00 : f32
    %206 = vector.broadcast %cst_57 : f32 to vector<8x128xf32>
    %207 = arith.addf %206, %205 : vector<8x128xf32>
    %208 = arith.divf %206, %207 : vector<8x128xf32>
    %209 = vector.extract_strided_slice %196 {offsets = [0, 256], sizes = [8, 128], strides = [1, 1]} : vector<8x512xf32> to vector<8x128xf32>
    %210 = math.tanh %209 : vector<8x128xf32>
    %211 = vector.extract_strided_slice %196 {offsets = [0, 384], sizes = [8, 128], strides = [1, 1]} : vector<8x512xf32> to vector<8x128xf32>
    %212 = arith.negf %211 : vector<8x128xf32>
    %213 = math.exp %212 : vector<8x128xf32>
    %cst_58 = arith.constant 1.000000e+00 : f32
    %214 = vector.broadcast %cst_58 : f32 to vector<8x128xf32>
    %215 = arith.addf %214, %213 : vector<8x128xf32>
    %216 = arith.divf %214, %215 : vector<8x128xf32>
    %217 = arith.mulf %208, %184 : vector<8x128xf32>
    %218 = arith.mulf %202, %210 : vector<8x128xf32>
    %219 = arith.addf %217, %218 : vector<8x128xf32>
    %220 = math.tanh %219 : vector<8x128xf32>
    %221 = arith.mulf %216, %220 : vector<8x128xf32>
    %c6_i32 = arith.constant 6 : i32
    %c0_i32_59 = arith.constant 0 : i32
    %222 = arith.cmpi eq, %arg0, %c0_i32_59 : i32
    %c7_i32_60 = arith.constant 7 : i32
    %223 = arith.subi %c7_i32_60, %c6_i32 : i32
    %224 = arith.select %222, %c6_i32, %223 : i32
    %c8_i32_61 = arith.constant 8 : i32
    %225 = arith.muli %224, %c8_i32_61 : i32
    %226 = tpu.assume_multiple %225, 8 : i32
    %227 = arith.index_cast %226 : i32 to index
    %c0_62 = arith.constant 0 : index
    %228 = vector.load %arg6[%227, %c0_62] : memref<64x512xf32, #tpu.memory_space<vmem>>, vector<8x512xf32>
    %229 = arith.truncf %221 : vector<8x128xf32> to vector<8x128xbf16>
    %cst_63 = arith.constant dense<0.000000e+00> : vector<8x512xf32>
    %230 = tpu.matmul %229, %10, %cst_63 {dimension_numbers = #tpu.dot_dimension_numbers<[1], [0], [0], [1], [0, 0, 1, 1], [], []>} : vector<8x128xbf16>, vector<128x512xbf16>, vector<8x512xf32> -> vector<8x512xf32>
    %231 = arith.addf %228, %230 : vector<8x512xf32>
    %232 = vector.extract_strided_slice %231 {offsets = [0, 0], sizes = [8, 128], strides = [1, 1]} : vector<8x512xf32> to vector<8x128xf32>
    %233 = arith.negf %232 : vector<8x128xf32>
    %234 = math.exp %233 : vector<8x128xf32>
    %cst_64 = arith.constant 1.000000e+00 : f32
    %235 = vector.broadcast %cst_64 : f32 to vector<8x128xf32>
    %236 = arith.addf %235, %234 : vector<8x128xf32>
    %237 = arith.divf %235, %236 : vector<8x128xf32>
    %238 = vector.extract_strided_slice %231 {offsets = [0, 128], sizes = [8, 128], strides = [1, 1]} : vector<8x512xf32> to vector<8x128xf32>
    %239 = arith.negf %238 : vector<8x128xf32>
    %240 = math.exp %239 : vector<8x128xf32>
    %cst_65 = arith.constant 1.000000e+00 : f32
    %241 = vector.broadcast %cst_65 : f32 to vector<8x128xf32>
    %242 = arith.addf %241, %240 : vector<8x128xf32>
    %243 = arith.divf %241, %242 : vector<8x128xf32>
    %244 = vector.extract_strided_slice %231 {offsets = [0, 256], sizes = [8, 128], strides = [1, 1]} : vector<8x512xf32> to vector<8x128xf32>
    %245 = math.tanh %244 : vector<8x128xf32>
    %246 = vector.extract_strided_slice %231 {offsets = [0, 384], sizes = [8, 128], strides = [1, 1]} : vector<8x512xf32> to vector<8x128xf32>
    %247 = arith.negf %246 : vector<8x128xf32>
    %248 = math.exp %247 : vector<8x128xf32>
    %cst_66 = arith.constant 1.000000e+00 : f32
    %249 = vector.broadcast %cst_66 : f32 to vector<8x128xf32>
    %250 = arith.addf %249, %248 : vector<8x128xf32>
    %251 = arith.divf %249, %250 : vector<8x128xf32>
    %252 = arith.mulf %243, %219 : vector<8x128xf32>
    %253 = arith.mulf %237, %245 : vector<8x128xf32>
    %254 = arith.addf %252, %253 : vector<8x128xf32>
    %255 = math.tanh %254 : vector<8x128xf32>
    %256 = arith.mulf %251, %255 : vector<8x128xf32>
    %c7_i32_67 = arith.constant 7 : i32
    %c0_i32_68 = arith.constant 0 : i32
    %257 = arith.cmpi eq, %arg0, %c0_i32_68 : i32
    %c7_i32_69 = arith.constant 7 : i32
    %258 = arith.subi %c7_i32_69, %c7_i32_67 : i32
    %259 = arith.select %257, %c7_i32_67, %258 : i32
    %c8_i32_70 = arith.constant 8 : i32
    %260 = arith.muli %259, %c8_i32_70 : i32
    %261 = tpu.assume_multiple %260, 8 : i32
    %262 = arith.index_cast %261 : i32 to index
    %c0_71 = arith.constant 0 : index
    %263 = vector.load %arg6[%262, %c0_71] : memref<64x512xf32, #tpu.memory_space<vmem>>, vector<8x512xf32>
    %264 = arith.truncf %256 : vector<8x128xf32> to vector<8x128xbf16>
    %cst_72 = arith.constant dense<0.000000e+00> : vector<8x512xf32>
    %265 = tpu.matmul %264, %10, %cst_72 {dimension_numbers = #tpu.dot_dimension_numbers<[1], [0], [0], [1], [0, 0, 1, 1], [], []>} : vector<8x128xbf16>, vector<128x512xbf16>, vector<8x512xf32> -> vector<8x512xf32>
    %266 = arith.addf %263, %265 : vector<8x512xf32>
    %267 = vector.extract_strided_slice %266 {offsets = [0, 0], sizes = [8, 128], strides = [1, 1]} : vector<8x512xf32> to vector<8x128xf32>
    %268 = arith.negf %267 : vector<8x128xf32>
    %269 = math.exp %268 : vector<8x128xf32>
    %cst_73 = arith.constant 1.000000e+00 : f32
    %270 = vector.broadcast %cst_73 : f32 to vector<8x128xf32>
    %271 = arith.addf %270, %269 : vector<8x128xf32>
    %272 = arith.divf %270, %271 : vector<8x128xf32>
    %273 = vector.extract_strided_slice %266 {offsets = [0, 128], sizes = [8, 128], strides = [1, 1]} : vector<8x512xf32> to vector<8x128xf32>
    %274 = arith.negf %273 : vector<8x128xf32>
    %275 = math.exp %274 : vector<8x128xf32>
    %cst_74 = arith.constant 1.000000e+00 : f32
    %276 = vector.broadcast %cst_74 : f32 to vector<8x128xf32>
    %277 = arith.addf %276, %275 : vector<8x128xf32>
    %278 = arith.divf %276, %277 : vector<8x128xf32>
    %279 = vector.extract_strided_slice %266 {offsets = [0, 256], sizes = [8, 128], strides = [1, 1]} : vector<8x512xf32> to vector<8x128xf32>
    %280 = math.tanh %279 : vector<8x128xf32>
    %281 = vector.extract_strided_slice %266 {offsets = [0, 384], sizes = [8, 128], strides = [1, 1]} : vector<8x512xf32> to vector<8x128xf32>
    %282 = arith.negf %281 : vector<8x128xf32>
    %283 = math.exp %282 : vector<8x128xf32>
    %cst_75 = arith.constant 1.000000e+00 : f32
    %284 = vector.broadcast %cst_75 : f32 to vector<8x128xf32>
    %285 = arith.addf %284, %283 : vector<8x128xf32>
    %286 = arith.divf %284, %285 : vector<8x128xf32>
    %287 = arith.mulf %278, %254 : vector<8x128xf32>
    %288 = arith.mulf %272, %280 : vector<8x128xf32>
    %289 = arith.addf %287, %288 : vector<8x128xf32>
    %290 = math.tanh %289 : vector<8x128xf32>
    %291 = arith.mulf %286, %290 : vector<8x128xf32>
    %c8_i32_76 = arith.constant 8 : i32
    %c0_77 = arith.constant 0 : index
    %c0_78 = arith.constant 0 : index
    %c0_79 = arith.constant 0 : index
    %292 = vector.load %arg5[%c0_77, %c0_78, %c0_79] : memref<1x8x128xf32, #tpu.memory_space<vmem>>, vector<1x8x128xf32>
    %293 = vector.shape_cast %292 : vector<1x8x128xf32> to vector<8x128xf32>
    %294 = vector.shape_cast %291 : vector<8x128xf32> to vector<1x8x128xf32>
    tpu.vector_store %arg5[%c0_77, %c0_78, %c0_79], %294 {strides = array<i32>} : memref<1x8x128xf32, #tpu.memory_space<vmem>>, vector<1x8x128xf32>,
    return
  }
  func.func @transform_0(%arg0: i32) -> (i32, i32) {
    %c0_i32 = arith.constant 0 : i32
    %c0_i32_0 = arith.constant 0 : i32
    %c0_i32_1 = arith.constant 0 : i32
    return %c0_i32, %c0_i32_0 : i32, i32
  }
  func.func @transform_1(%arg0: i32) -> (i32, i32, i32) {
    %c0_i32 = arith.constant 0 : i32
    %c0_i32_0 = arith.constant 0 : i32
    %c0_i32_1 = arith.constant 0 : i32
    return %arg0, %c0_i32, %c0_i32_0 : i32, i32, i32
  }
  func.func @transform_2(%arg0: i32) -> (i32, i32, i32) {
    %c0_i32 = arith.constant 0 : i32
    %c0_i32_0 = arith.constant 0 : i32
    %c0_i32_1 = arith.constant 0 : i32
    return %arg0, %c0_i32, %c0_i32_0 : i32, i32, i32
  }
  func.func @transform_3(%arg0: i32) -> (i32, i32, i32) {
    %c0_i32 = arith.constant 0 : i32
    %c0_i32_0 = arith.constant 0 : i32
    %c0_i32_1 = arith.constant 0 : i32
    return %arg0, %c0_i32, %c0_i32_0 : i32, i32, i32
  }
  func.func @transform_4(%arg0: i32) -> (i32, i32, i32) {
    %c0_i32 = arith.constant 0 : i32
    %c0_i32_0 = arith.constant 0 : i32
    %c0_i32_1 = arith.constant 0 : i32
    return %arg0, %c0_i32, %c0_i32_0 : i32, i32, i32
  }
}

</mosaic_0001>

<bundles_post_ra>
// kernel: lstm_model_forward.1
= control target key start
LH: loop header
LB: loop body
LE: loop exit
PB: predicated region body
PF: predicated region fallthrough
CT: control target
= control target key end

     0   :  { %s2175_s15 = smov 0   ;;  %s2785_s0 = inlined_call_operand.vmem [shape: bf16[64,32], index: 0, kind: input, shape index: {}]   ;;  %s2786_s1 = inlined_call_operand.vmem [shape: bf16[2,32,512], index: 1, kind: input, shape index: {}]   ;;  %s2787_s2 = inlined_call_operand.vmem [shape: bf16[2,128,512], index: 2, kind: input, shape index: {}]   ;;  %s2788_s3 = inlined_call_operand.vmem [shape: f32[2,1,512], index: 3, kind: input, shape index: {}]   ;;  %s2789_s4 = inlined_call_operand.vmem [shape: f32[2,8,128], index: 4, kind: output, shape index: {}]  }
   0x1 LB: > { %s2181_s16 = sadd.s32 4294967295, %s2147_s15   ;;  %p1789_p0 = scmp.ge.s32.totalorder %s2147_s15, 1  ;;  %s2147_s15 = sphi %s2175_s15, %s14_s15  }
   0x2   : > { %p181_p1 = scmp.lt.s32.totalorder %s2147_s15, 3 }
   0x4   : > { %p182_p2 = pnand %p1789_p0, %p181_p1 }
   0x5   : > { %p215_p3 = scmp.lt.s32.totalorder (!%p182_p2), %s2181_s16, 1  ;;  %v2149_v0 = vmov (!%p182_p2), 0   ;;  %v1929_v9 = vld [vmem:[%s2785_s0] sm:$0xff] (!%p182_p2)   ;;  %vm332_vm0 = vcmask (!%p182_p2), 261120   ;;  %v1939_v20 = vld [vmem:[%s2785_s0 + $0x8] sm:$0xff] (!%p182_p2)   ;;  %v1952_v29 = vld [vmem:[%s2785_s0 + $0x10] sm:$0xff] (!%p182_p2)   ;;  %v252_v45 = vlaneseq (!%p182_p2) }
   0x6   : > { %185 = sbr.rel (%p182_p2) target bundleno = 2142 (0x85e), region = 36  ;;  %377 = vmatprep.mubr.bf16.mxu0 (!%p182_p2), %v2149_v0  ;;  %450 = vmatprep.mubr.bf16.mxu1 (!%p182_p2), %v2149_v0  ;;  %v1965_v38 = vld [vmem:[%s2785_s0 + $0x18] sm:$0xff] (!%p182_p2)   ;;  %p555_p4 = scmp.eq.s32.totalorder (!%p182_p2), %s2181_s16, 0 }
   0x7   : > { %v253_v46 = vshrl.u32 (!%p182_p2), %v252_v45, 7 }
   0x9   : > { %v254_v47 = vsub.s32 (!%p182_p2), 0, %v253_v46  ;;  %v262_v48 = vsub.s32 (!%p182_p2), 2, %v253_v46  ;;  %v258_v50 = vsub.s32 (!%p182_p2), 1, %v253_v46  ;;  %v266_v51 = vsub.s32 (!%p182_p2), 3, %v253_v46 }
   0xd   : > { %s2189_s17 = scalar_select %p215_p3, %s2181_s16, 1 }
   0xe   : > { %s556_s12 = scalar_select %p555_p4, 0, 7 }
   0xf   : > { %s1898_s18 = sshll.u32 %s2189_s17, 6  ;;  %s1899_s22 = sshll.u32 %s2189_s17, 8 }
  0x10   : > { %s219_s21 = scalar_lea.vmem %s2786_s1, %s1898_s18  ;;  %s2199_s25 = scalar_lea.vmem %s2787_s2, %s1899_s22 }
  0x11   : > { %v1917_v1 = vld [vmem:[%s219_s21 + $0x4] ss:$16 sps:$4 sm:$0xff]   ;;  %v1919_v2 = vld [vmem:[%s219_s21 + $0xc] ss:$16 sps:$4 sm:$0xff]   ;;  %v1921_v3 = vld [vmem:[%s219_s21] ss:$16 sps:$4 sm:$0xff]  }
  0x12   : > { %345 = vmatprep.subr.bf16.mxu0 %v1917_v1  ;;  %v1922_v4 = vld [vmem:[%s219_s21 + $0x8] ss:$16 sps:$4 sm:$0xff]   ;;  %418 = vmatprep.subr.bf16.mxu1 %v1919_v2  ;;  %v1923_v5 = vld [vmem:[%s219_s21 + $0x24] ss:$16 sps:$4 sm:$0xff]   ;;  %v1925_v6 = vld [vmem:[%s219_s21 + $0x2c] ss:$16 sps:$4 sm:$0xff]  }
  0x13   : > { %346 = vmatpush1.bf16.msra.mxu0 %v1921_v3  ;;  %419 = vmatpush1.bf16.msra.mxu1 %v1922_v4  ;;  %v1927_v7 = vld [vmem:[%s219_s21 + $0x20] ss:$16 sps:$4 sm:$0xff]   ;;  %v1928_v8 = vld [vmem:[%s219_s21 + $0x28] ss:$16 sps:$4 sm:$0xff]   ;;  %v2205_v10 = vld [vmem:[%s2199_s25 + $0x4] ss:$16 sps:$4 sm:$0xff]  }
  0x14   : > { %347 = vmatprep.subr.bf16.mxu0 %v1923_v5  ;;  %420 = vmatprep.subr.bf16.mxu1 %v1925_v6  ;;  %v2208_v11 = vld [vmem:[%s2199_s25 + $0xc] ss:$16 sps:$4 sm:$0xff]   ;;  %v2211_v12 = vld [vmem:[%s2199_s25] ss:$16 sps:$4 sm:$0xff]   ;;  %v2216_v13 = vld [vmem:[%s2199_s25 + $0x24] ss:$16 sps:$4 sm:$0xff]  }
  0x15   : > { %v2219_v14 = vld [vmem:[%s2199_s25 + $0x8] ss:$16 sps:$4 sm:$0xff]   ;;  %v2222_v15 = vld [vmem:[%s2199_s25 + $0x2c] ss:$16 sps:$4 sm:$0xff]   ;;  %v2227_v16 = vld [vmem:[%s2199_s25 + $0x20] ss:$16 sps:$4 sm:$0xff]  }
  0x16   : > { %v2230_v17 = vld [vmem:[%s2199_s25 + $0x44] ss:$16 sps:$4 sm:$0xff]   ;;  %v2235_v18 = vld [vmem:[%s2199_s25 + $0x28] ss:$16 sps:$4 sm:$0xff]   ;;  %v2240_v19 = vld [vmem:[%s2199_s25 + $0x4c] ss:$16 sps:$4 sm:$0xff]  }
  0x17   : > { %348 = vmatpush1.bf16.msra.mxu0 %v1927_v7  ;;  %421 = vmatpush1.bf16.msra.mxu1 %v1928_v8  ;;  %v2248_v21 = vld [vmem:[%s2199_s25 + $0x40] ss:$16 sps:$4 sm:$0xff]   ;;  %v2253_v22 = vld [vmem:[%s2199_s25 + $0x48] ss:$16 sps:$4 sm:$0xff]   ;;  %v2258_v23 = vld [vmem:[%s2199_s25 + $0x64] ss:$16 sps:$4 sm:$0xff]  }
  0x18   : > { %727 = vmatprep.subr.bf16.mxu0 %v2205_v10  ;;  %768 = vmatprep.subr.bf16.mxu1 %v2208_v11  ;;  %v2261_v24 = vld [vmem:[%s2199_s25 + $0x6c] ss:$16 sps:$4 sm:$0xff]   ;;  %v2266_v25 = vld [vmem:[%s2199_s25 + $0x60] ss:$16 sps:$4 sm:$0xff]   ;;  %v2269_v26 = vld [vmem:[%s2199_s25 + $0x84] ss:$16 sps:$4 sm:$0xff]  }
  0x19   : > { %v2274_v27 = vld [vmem:[%s2199_s25 + $0x68] ss:$16 sps:$4 sm:$0xff]   ;;  %v2279_v28 = vld [vmem:[%s2199_s25 + $0x8c] ss:$16 sps:$4 sm:$0xff]   ;;  %v2287_v30 = vld [vmem:[%s2199_s25 + $0x80] ss:$16 sps:$4 sm:$0xff]  }
  0x1a   : > { %1808 = vmatmul.mubr.msk.bf16.vlgmr.msra.gmra.mrb[0].mxu0 %vm332_vm0, %v1929_v9  ;;  %1812 = vmatmul.mubr.msk.bf16.vlgmr.msra.gmra.mrb[0].mxu1 %vm332_vm0, %v1929_v9  ;;  %v2292_v31 = vld [vmem:[%s2199_s25 + $0x88] ss:$16 sps:$4 sm:$0xff]   ;;  %v2297_v32 = vld [vmem:[%s2199_s25 + $0xa4] ss:$16 sps:$4 sm:$0xff]   ;;  %v2300_v33 = vld [vmem:[%s2199_s25 + $0xac] ss:$16 sps:$4 sm:$0xff]  }
  0x1b   : > { %728 = vmatpush1.bf16.msra.mxu0 %v2211_v12  ;;  %769 = vmatpush1.bf16.msra.mxu1 %v2219_v14  ;;  %v2307_v34 = vld [vmem:[%s2199_s25 + $0xa0] ss:$16 sps:$4 sm:$0xff]   ;;  %v2310_v35 = vld [vmem:[%s2199_s25 + $0xa8] ss:$16 sps:$4 sm:$0xff]   ;;  %v2315_v36 = vld [vmem:[%s2199_s25 + $0xc4] ss:$16 sps:$4 sm:$0xff]  }
  0x1c   : > { %729 = vmatprep.subr.bf16.mxu0 %v2216_v13  ;;  %387 = vmatprep.mubr.bf16.mxu0 %v2149_v0  ;;  %v2318_v37 = vld [vmem:[%s2199_s25 + $0xcc] ss:$16 sps:$4 sm:$0xff]   ;;  %v2328_v39 = vld [vmem:[%s2199_s25 + $0xc0] ss:$16 sps:$4 sm:$0xff]   ;;  %v2331_v40 = vld [vmem:[%s2199_s25 + $0xc8] ss:$16 sps:$4 sm:$0xff]  }
  0x1d   : > { %460 = vmatprep.mubr.bf16.mxu1 %v2149_v0  ;;  %770 = vmatprep.subr.bf16.mxu1 %v2222_v15  ;;  %v2336_v41 = vld [vmem:[%s2199_s25 + $0xe4] ss:$16 sps:$4 sm:$0xff]   ;;  %v2339_v42 = vld [vmem:[%s2199_s25 + $0xec] ss:$16 sps:$4 sm:$0xff]   ;;  %v2346_v43 = vld [vmem:[%s2199_s25 + $0xe0] ss:$16 sps:$4 sm:$0xff]  }
  0x1e   : > { %v2349_v44 = vld [vmem:[%s2199_s25 + $0xe8] ss:$16 sps:$4 sm:$0xff]   ;;  %s1794_s8 = sshll.u32 %s2189_s17, 2  ;;  %s1816_s13 = sshll.u32 %s556_s12, 3 }
  0x1f   : > { %730 = vmatpush1.bf16.msra.mxu0 %v2227_v16  ;;  %771 = vmatpush1.bf16.msra.mxu1 %v2235_v18  ;;  %s228_s11 = scalar_lea.vmem %s2788_s3, %s1794_s8  ;;  %s558_s14 = sshra.s32 %s1816_s13, 3 }
  0x20   : > { %731 = vmatprep.subr.bf16.mxu0 %v2230_v17  ;;  %772 = vmatprep.subr.bf16.mxu1 %v2240_v19  ;;  %v250_v49 = vld [vmem:[%s228_s11] sm:$0xf]  ;;  %s1900_s18 = sshll.u32 %s558_s14, 5  ;;  %s1795_s16 = sshll.u32 %s2189_s17, 3 }
  0x21   : > { %v2399_v52 = vrot.slane %v250_v49, %v254_v47  ;;  %v2401_v53 = vrot.slane %v250_v49, %v262_v48  ;;  %v2403_v54 = vrot.slane %v250_v49, %v258_v50  ;;  %v2405_v55 = vrot.slane %v250_v49, %v266_v51  ;;  %s562_s19 = scalar_lea.vmem [#allocation2], %s1900_s18 }
  0x22   : > { %1809 = vmatmul.mubr.msk.bf16.gmra.mrb[4].mxu0 %vm332_vm0, %v1939_v20  ;;  %1813 = vmatmul.mubr.msk.bf16.gmra.mrb[4].mxu1 %vm332_vm0, %v1939_v20  ;;  %s837_s20 = scalar_select %p555_p4, 1, 6 }
  0x23   : > { %732 = vmatpush1.bf16.msra.mxu0 %v2248_v21  ;;  %773 = vmatpush1.bf16.msra.mxu1 %v2253_v22  ;;  %s959_s26 = scalar_select %p555_p4, 2, 5 }
  0x24   : > { %733 = vmatprep.subr.bf16.mxu0 %v2258_v23  ;;  %397 = vmatprep.mubr.bf16.mxu0 %v2149_v0  ;;  %s1854_s21 = sshll.u32 %s837_s20, 3 }
  0x25   : > { %470 = vmatprep.mubr.bf16.mxu1 %v2149_v0  ;;  %774 = vmatprep.subr.bf16.mxu1 %v2261_v24  ;;  %s839_s22 = sshra.s32 %s1854_s21, 3  ;;  %s1860_s27 = sshll.u32 %s959_s26, 3 }
  0x26   : > { %s1901_s23 = sshll.u32 %s839_s22, 5  ;;  %s961_s28 = sshra.s32 %s1860_s27, 3 }
  0x27   : > { %734 = vmatpush1.bf16.msra.mxu0 %v2266_v25  ;;  %775 = vmatpush1.bf16.msra.mxu1 %v2274_v27  ;;  %s843_s24 = scalar_lea.vmem [#allocation2], %s1901_s23  ;;  %s1902_s29 = sshll.u32 %s961_s28, 5 }
  0x28   : > { %735 = vmatprep.subr.bf16.mxu0 %v2269_v26  ;;  %776 = vmatprep.subr.bf16.mxu1 %v2279_v28  ;;  %s965_s30 = scalar_lea.vmem [#allocation2], %s1902_s29 }
  0x29   : > { %s1081_s5 = scalar_select %p555_p4, 3, 4 }
  0x2a   : > { %1810 = vmatmul.mubr.msk.bf16.gmra.mrb[8].mxu0 %vm332_vm0, %v1952_v29  ;;  %1814 = vmatmul.mubr.msk.bf16.gmra.mrb[8].mxu1 %vm332_vm0, %v1952_v29  ;;  %s1203_s10 = scalar_select %p555_p4, 4, 3 }
  0x2b   : > { %736 = vmatpush1.bf16.msra.mxu0 %v2287_v30  ;;  %777 = vmatpush1.bf16.msra.mxu1 %v2292_v31  ;;  %s1866_s6 = sshll.u32 %s1081_s5, 3 }
  0x2c   : > { %737 = vmatprep.subr.bf16.mxu0 %v2297_v32  ;;  %407 = vmatprep.mubr.bf16.mxu0 %v2149_v0  ;;  %s1083_s7 = sshra.s32 %s1866_s6, 3  ;;  %s1872_s11 = sshll.u32 %s1203_s10, 3 }
  0x2d   : > { %480 = vmatprep.mubr.bf16.mxu1 %v2149_v0  ;;  %778 = vmatprep.subr.bf16.mxu1 %v2300_v33  ;;  %s1903_s8 = sshll.u32 %s1083_s7, 5  ;;  %s1205_s12 = sshra.s32 %s1872_s11, 3 }
  0x2e   : > { %s1087_s9 = scalar_lea.vmem [#allocation2], %s1903_s8  ;;  %s1904_s13 = sshll.u32 %s1205_s12, 5 }
  0x2f   : > { %738 = vmatpush1.bf16.msra.mxu0 %v2307_v34  ;;  %779 = vmatpush1.bf16.msra.mxu1 %v2310_v35  ;;  %s1209_s14 = scalar_lea.vmem [#allocation2], %s1904_s13 }
  0x30   : > { %739 = vmatprep.subr.bf16.mxu0 %v2315_v36  ;;  %780 = vmatprep.subr.bf16.mxu1 %v2318_v37  ;;  %s1325_s18 = scalar_select %p555_p4, 5, 2 }
  0x31   : > { %s1569_s28 = scalar_select %p555_p4, 7, 0 }
  0x32   : > { %1811 = vmatmul.mubr.msk.bf16.gmra.mrb[12].mxu0 %vm332_vm0, %v1965_v38  ;;  %1815 = vmatmul.mubr.msk.bf16.gmra.mrb[12].mxu1 %vm332_vm0, %v1965_v38 }
  0x33   : > { %740 = vmatpush1.bf16.msra.mxu0 %v2328_v39  ;;  %781 = vmatpush1.bf16.msra.mxu1 %v2331_v40  ;;  %s1890_s29 = sshll.u32 %s1569_s28, 3 }
  0x34   : > { %741 = vmatprep.subr.bf16.mxu0 %v2336_v41  ;;  %759 = vmatprep.mubr.bf16.mxu0 %v2149_v0 }
  0x35   : > { %782 = vmatprep.subr.bf16.mxu1 %v2339_v42  ;;  %800 = vmatprep.mubr.bf16.mxu1 %v2149_v0 }
  0x37   : > { %742 = vmatpush1.bf16.msra.mxu0 %v2346_v43  ;;  %783 = vmatpush1.bf16.msra.mxu1 %v2349_v44 }
  0x38   : > { %849 = vmatprep.subr.bf16.mxu0 %v2205_v10  ;;  %890 = vmatprep.subr.bf16.mxu1 %v2208_v11 }
  0x3a   : > { %760 = vmatmul.mubr.bf16.vlgmr.msra.gmra.mrb[16].mxu0 %v2149_v0  ;;  %801 = vmatmul.mubr.bf16.vlgmr.msra.gmra.mrb[16].mxu1 %v2149_v0 }
  0x3b   : > { %850 = vmatpush1.bf16.msra.mxu0 %v2211_v12  ;;  %891 = vmatpush1.bf16.msra.mxu1 %v2219_v14 }
  0x3c   : > { %851 = vmatprep.subr.bf16.mxu0 %v2216_v13  ;;  %892 = vmatprep.subr.bf16.mxu1 %v2222_v15 }
  0x3d   : > { %881 = vmatprep.mubr.bf16.mxu0 %v2149_v0  ;;  %922 = vmatprep.mubr.bf16.mxu1 %v2149_v0 }
  0x3f   : > { %852 = vmatpush1.bf16.msra.mxu0 %v2227_v16  ;;  %893 = vmatpush1.bf16.msra.mxu1 %v2235_v18 }
  0x40   : > { %853 = vmatprep.subr.bf16.mxu0 %v2230_v17  ;;  %894 = vmatprep.subr.bf16.mxu1 %v2240_v19 }
  0x43   : > { %854 = vmatpush1.bf16.msra.mxu0 %v2248_v21  ;;  %895 = vmatpush1.bf16.msra.mxu1 %v2253_v22 }
  0x44   : > { %855 = vmatprep.subr.bf16.mxu0 %v2258_v23  ;;  %896 = vmatprep.subr.bf16.mxu1 %v2261_v24 }
  0x47   : > { %856 = vmatpush1.bf16.msra.mxu0 %v2266_v25  ;;  %897 = vmatpush1.bf16.msra.mxu1 %v2274_v27 }
  0x48   : > { %857 = vmatprep.subr.bf16.mxu0 %v2269_v26  ;;  %898 = vmatprep.subr.bf16.mxu1 %v2279_v28 }
  0x4b   : > { %858 = vmatpush1.bf16.msra.mxu0 %v2287_v30  ;;  %899 = vmatpush1.bf16.msra.mxu1 %v2292_v31 }
  0x4c   : > { %859 = vmatprep.subr.bf16.mxu0 %v2297_v32  ;;  %900 = vmatprep.subr.bf16.mxu1 %v2300_v33 }
  0x4f   : > { %860 = vmatpush1.bf16.msra.mxu0 %v2307_v34  ;;  %901 = vmatpush1.bf16.msra.mxu1 %v2310_v35 }
  0x50   : > { %861 = vmatprep.subr.bf16.mxu0 %v2315_v36  ;;  %902 = vmatprep.subr.bf16.mxu1 %v2318_v37 }
  0x53   : > { %862 = vmatpush1.bf16.msra.mxu0 %v2328_v39  ;;  %903 = vmatpush1.bf16.msra.mxu1 %v2331_v40 }
  0x54   : > { %863 = vmatprep.subr.bf16.mxu0 %v2336_v41  ;;  %904 = vmatprep.subr.bf16.mxu1 %v2339_v42 }
  0x57   : > { %864 = vmatpush1.bf16.msra.mxu0 %v2346_v43  ;;  %905 = vmatpush1.bf16.msra.mxu1 %v2349_v44 }
  0x58   : > { %971 = vmatprep.subr.bf16.mxu0 %v2205_v10  ;;  %1012 = vmatprep.subr.bf16.mxu1 %v2208_v11 }
  0xed   : > { %v379_v56 = vpop.f32.mrb[0].mxu0  ;;  %v452_v57 = vpop.f32.mrb[0].mxu1 }
  0xee   : > { %v380_v58 = vadd.f32 %v379_v56, %v2399_v52  ;;  %v381_v59 = vpop.f32.mrb[1].mxu0  ;;  %v453_v60 = vadd.f32 %v452_v57, %v2401_v53  ;;  %v454_v61 = vpop.f32.mrb[1].mxu1 }
  0xef   : > { %v382_v62 = vadd.f32 %v381_v59, %v2403_v54  ;;  %v383_v63 = vpop.f32.mrb[2].mxu0  ;;  %v455_v1 = vadd.f32 %v454_v61, %v2405_v55  ;;  %v456_v2 = vpop.f32.mrb[2].mxu1 }
  0xf0   : > { %491 = vst [vmem:[#allocation2] sm:$0xff] %v380_v58  ;;  %v384_v3 = vadd.f32 %v383_v63, %v2399_v52  ;;  %v385_v4 = vpop.f32.mrb[3].mxu0  ;;  %493 = vst [vmem:[#allocation2 + $0x10] sm:$0xff] %v453_v60  ;;  %v457_v5 = vadd.f32 %v456_v2, %v2401_v53  ;;  %v458_v6 = vpop.f32.mrb[3].mxu1 }
  0xf1   : > { %492 = vst [vmem:[#allocation2 + $0x8] sm:$0xff] %v382_v62  ;;  %v386_v7 = vadd.f32 %v385_v4, %v2403_v54  ;;  %494 = vst [vmem:[#allocation2 + $0x18] sm:$0xff] %v455_v1  ;;  %v459_v8 = vadd.f32 %v458_v6, %v2405_v55 }
  0xf2   : > { %495 = vst [vmem:[#allocation2 + $0x20] sm:$0xff] %v384_v3  ;;  %497 = vst [vmem:[#allocation2 + $0x30] sm:$0xff] %v457_v5 }
  0xf3   : > { %496 = vst [vmem:[#allocation2 + $0x28] sm:$0xff] %v386_v7  ;;  %498 = vst [vmem:[#allocation2 + $0x38] sm:$0xff] %v459_v8 }
  0xf5   : > { %v389_v9 = vpop.f32.mrb[4].mxu0  ;;  %v462_v20 = vpop.f32.mrb[4].mxu1 }
  0xf6   : > { %v390_v29 = vadd.f32 %v389_v9, %v2399_v52  ;;  %v391_v38 = vpop.f32.mrb[5].mxu0  ;;  %v463_v45 = vadd.f32 %v462_v20, %v2401_v53  ;;  %v464_v46 = vpop.f32.mrb[5].mxu1 }
  0xf7   : > { %v392_v47 = vadd.f32 %v391_v38, %v2403_v54  ;;  %v393_v48 = vpop.f32.mrb[6].mxu0  ;;  %v465_v49 = vadd.f32 %v464_v46, %v2405_v55  ;;  %v466_v50 = vpop.f32.mrb[6].mxu1 }
  0xf8   : > { %499 = vst [vmem:[#allocation2 + $0x40] sm:$0xff] %v390_v29  ;;  %v394_v51 = vadd.f32 %v393_v48, %v2399_v52  ;;  %v395_v56 = vpop.f32.mrb[7].mxu0  ;;  %501 = vst [vmem:[#allocation2 + $0x50] sm:$0xff] %v463_v45  ;;  %v467_v57 = vadd.f32 %v466_v50, %v2401_v53  ;;  %v468_v58 = vpop.f32.mrb[7].mxu1 }
  0xf9   : > { %500 = vst [vmem:[#allocation2 + $0x48] sm:$0xff] %v392_v47  ;;  %v396_v59 = vadd.f32 %v395_v56, %v2403_v54  ;;  %502 = vst [vmem:[#allocation2 + $0x58] sm:$0xff] %v465_v49  ;;  %v469_v60 = vadd.f32 %v468_v58, %v2405_v55 }
  0xfa   : > { %503 = vst [vmem:[#allocation2 + $0x60] sm:$0xff] %v394_v51  ;;  %505 = vst [vmem:[#allocation2 + $0x70] sm:$0xff] %v467_v57 }
  0xfb   : > { %504 = vst [vmem:[#allocation2 + $0x68] sm:$0xff] %v396_v59  ;;  %506 = vst [vmem:[#allocation2 + $0x78] sm:$0xff] %v469_v60 }
  0xfd   : > { %v399_v61 = vpop.f32.mrb[8].mxu0  ;;  %v472_v62 = vpop.f32.mrb[8].mxu1 }
  0xfe   : > { %v400_v63 = vadd.f32 %v399_v61, %v2399_v52  ;;  %v401_v1 = vpop.f32.mrb[9].mxu0  ;;  %v473_v2 = vadd.f32 %v472_v62, %v2401_v53  ;;  %v474_v3 = vpop.f32.mrb[9].mxu1 }
  0xff   : > { %v402_v4 = vadd.f32 %v401_v1, %v2403_v54  ;;  %v403_v5 = vpop.f32.mrb[10].mxu0  ;;  %v475_v6 = vadd.f32 %v474_v3, %v2405_v55  ;;  %v476_v7 = vpop.f32.mrb[10].mxu1 }
 0x100   : > { %507 = vst [vmem:[#allocation2 + $0x80] sm:$0xff] %v400_v63  ;;  %v404_v8 = vadd.f32 %v403_v5, %v2399_v52  ;;  %v405_v9 = vpop.f32.mrb[11].mxu0  ;;  %509 = vst [vmem:[#allocation2 + $0x90] sm:$0xff] %v473_v2  ;;  %v477_v20 = vadd.f32 %v476_v7, %v2401_v53  ;;  %v478_v29 = vpop.f32.mrb[11].mxu1 }
 0x101   : > { %508 = vst [vmem:[#allocation2 + $0x88] sm:$0xff] %v402_v4  ;;  %v406_v38 = vadd.f32 %v405_v9, %v2403_v54  ;;  %510 = vst [vmem:[#allocation2 + $0x98] sm:$0xff] %v475_v6  ;;  %v479_v45 = vadd.f32 %v478_v29, %v2405_v55 }
 0x102   : > { %511 = vst [vmem:[#allocation2 + $0xa0] sm:$0xff] %v404_v8  ;;  %513 = vst [vmem:[#allocation2 + $0xb0] sm:$0xff] %v477_v20 }
 0x103   : > { %512 = vst [vmem:[#allocation2 + $0xa8] sm:$0xff] %v406_v38  ;;  %514 = vst [vmem:[#allocation2 + $0xb8] sm:$0xff] %v479_v45 }
 0x105   : > { %v409_v46 = vpop.f32.mrb[12].mxu0  ;;  %v482_v47 = vpop.f32.mrb[12].mxu1 }
 0x106   : > { %v410_v48 = vadd.f32 %v409_v46, %v2399_v52  ;;  %v483_v49 = vadd.f32 %v482_v47, %v2401_v53  ;;  %v411_v50 = vpop.f32.mrb[13].mxu0  ;;  %v484_v51 = vpop.f32.mrb[13].mxu1 }
 0x107   : > { %v412_v56 = vadd.f32 %v411_v50, %v2403_v54  ;;  %v485_v57 = vadd.f32 %v484_v51, %v2405_v55  ;;  %v413_v58 = vpop.f32.mrb[14].mxu0  ;;  %v486_v59 = vpop.f32.mrb[14].mxu1 }
 0x108   : > { %515 = vst [vmem:[#allocation2 + $0xc0] sm:$0xff] %v410_v48  ;;  %517 = vst [vmem:[#allocation2 + $0xd0] sm:$0xff] %v483_v49  ;;  %v414_v60 = vadd.f32 %v413_v58, %v2399_v52  ;;  %v487_v61 = vadd.f32 %v486_v59, %v2401_v53  ;;  %v415_v62 = vpop.f32.mrb[15].mxu0  ;;  %v488_v63 = vpop.f32.mrb[15].mxu1 }
 0x109   : > { %516 = vst [vmem:[#allocation2 + $0xc8] sm:$0xff] %v412_v56  ;;  %518 = vst [vmem:[#allocation2 + $0xd8] sm:$0xff] %v485_v57  ;;  %v416_v1 = vadd.f32 %v415_v62, %v2403_v54  ;;  %v489_v2 = vadd.f32 %v488_v63, %v2405_v55 }
 0x10a   : > { %519 = vst [vmem:[#allocation2 + $0xe0] sm:$0xff] %v414_v60  ;;  %521 = vst [vmem:[#allocation2 + $0xf0] sm:$0xff] %v487_v61 }
 0x10b   : > { %520 = vst [vmem:[#allocation2 + $0xe8] sm:$0xff] %v416_v1  ;;  %522 = vst [vmem:[#allocation2 + $0xf8] sm:$0xff] %v489_v2 }
 0x10d   : > { %v761_v3 = vpop.f32.mrb[16].mxu0  ;;  %v802_v4 = vpop.f32.mrb[16].mxu1 }
 0x10e   : > { %v763_v5 = vpop.f32.mrb[17].mxu0  ;;  %v804_v52 = vpop.f32.mrb[17].mxu1 }
 0x10f   : > { %v765_v6 = vpop.f32.mrb[18].mxu0  ;;  %v806_v53 = vpop.f32.mrb[18].mxu1 }
 0x110   : > { %v766_v7 = vpop.f32.mrb[19].mxu0  ;;  %v807_v8 = vpop.f32.mrb[19].mxu1 }
 0x112   : > { %v563_v9 = vld [vmem:[%s562_s19] sm:$0xff]  ;;  %v564_v29 = vld [vmem:[%s562_s19 + $0x8] sm:$0xff]  ;;  %v566_v45 = vld [vmem:[%s562_s19 + $0x18] sm:$0xff] }
 0x113   : > { %v809_v20 = vadd.f32 %v761_v3, %v563_v9  ;;  %v810_v54 = vadd.f32 %v763_v5, %v564_v29  ;;  %v812_v46 = vadd.f32 %v804_v52, %v566_v45  ;;  %v565_v47 = vld [vmem:[%s562_s19 + $0x10] sm:$0xff]  ;;  %v844_v6 = vld [vmem:[%s843_s24] sm:$0xff]  ;;  %v845_v29 = vld [vmem:[%s843_s24 + $0x8] sm:$0xff]  ;;  %s1878_s19 = sshll.u32 %s1325_s18, 3 }
 0x114   : > { %v811_v49 = vadd.f32 %v802_v4, %v565_v47  ;;  %v846_v7 = vld [vmem:[%s843_s24 + $0x10] sm:$0xff]  ;;  %s1327_s20 = sshra.s32 %s1878_s19, 3 }
 0x115   : > { %v1851_v38 = vmul.f32 -1.442695, %v809_v20  ;;  %v1852_v55 = vmul.f32 -1.442695, %v810_v54  ;;  %v1853_v48 = vmul.f32 -1.442695, %v812_v46 }
 0x116   : > { %s1905_s21 = sshll.u32 %s1327_s20, 5 }
 0x117   : > { %1981 = vpow2.f32 %v1851_v38  ;;  %v847_v38 = vld [vmem:[%s843_s24 + $0x18] sm:$0xff]  ;;  %s1331_s22 = scalar_lea.vmem [#allocation2], %s1905_s21 }
 0x118   : > { %1983 = vpow2.f32 %v1852_v55 }
 0x119   : > { %1985 = vpow2.f32 %v1853_v48 }
 0x11a   : > { %1987 = vtanh.f32 %v811_v49 }
 0x121   : > { %v1982_v50 = vpop.eup %1981 }
 0x122   : > { %v1984_v51 = vpop.eup %1983  ;;  %v816_v56 = vadd.f32 1.0, %v1982_v50 }
 0x123   : > { %v822_v57 = vadd.f32 1.0, %v1984_v51  ;;  %v1986_v58 = vpop.eup %1985 }
 0x124   : > { %1989 = vrcp.f32 %v816_v56  ;;  %v1988_v59 = vpop.eup %1987  ;;  %v829_v63 = vadd.f32 1.0, %v1986_v58 }
 0x125   : > { %1991 = vrcp.f32 %v822_v57 }
 0x126   : > { %1993 = vrcp.f32 %v829_v63 }
 0x12e   : > { %v1990_v60 = vpop.eup %1989 }
 0x12f   : > { %v1992_v61 = vpop.eup %1991  ;;  %v833_v62 = vmul.f32 %v1990_v60, %v1988_v59 }
 0x130   : > { %v832_v1 = vmul.f32 0.0, %v1992_v61  ;;  %v1994_v3 = vpop.eup %1993 }
 0x132   : > { %v2442_v2 = vadd.f32 %v833_v62, %v832_v1 }
 0x134   : > { %1995 = vtanh.f32 %v2442_v2 }
 0x13e   : > { %v1996_v4 = vpop.eup %1995 }
 0x13f   : > { %v836_v5 = vmul.f32 %v1996_v4, %v1994_v3 }
 0x141   : > { %v848_v52 = vpack.c.bf16 %v836_v5, %v836_v5 }
 0x143   : > { %882 = vmatmul.mubr.bf16.vlgmr.msra.gmra.mrb[20].mxu0 %v848_v52  ;;  %923 = vmatmul.mubr.bf16.vlgmr.msra.gmra.mrb[20].mxu1 %v848_v52 }
 0x144   : > { %972 = vmatpush1.bf16.msra.mxu0 %v2211_v12  ;;  %1013 = vmatpush1.bf16.msra.mxu1 %v2219_v14 }
 0x145   : > { %973 = vmatprep.subr.bf16.mxu0 %v2216_v13  ;;  %1014 = vmatprep.subr.bf16.mxu1 %v2222_v15 }
 0x146   : > { %1003 = vmatprep.mubr.bf16.mxu0 %v2149_v0  ;;  %1044 = vmatprep.mubr.bf16.mxu1 %v2149_v0 }
 0x148   : > { %974 = vmatpush1.bf16.msra.mxu0 %v2227_v16  ;;  %1015 = vmatpush1.bf16.msra.mxu1 %v2235_v18 }
 0x149   : > { %975 = vmatprep.subr.bf16.mxu0 %v2230_v17  ;;  %1016 = vmatprep.subr.bf16.mxu1 %v2240_v19 }
 0x14c   : > { %976 = vmatpush1.bf16.msra.mxu0 %v2248_v21  ;;  %1017 = vmatpush1.bf16.msra.mxu1 %v2253_v22 }
 0x14d   : > { %977 = vmatprep.subr.bf16.mxu0 %v2258_v23  ;;  %1018 = vmatprep.subr.bf16.mxu1 %v2261_v24 }
 0x150   : > { %978 = vmatpush1.bf16.msra.mxu0 %v2266_v25  ;;  %1019 = vmatpush1.bf16.msra.mxu1 %v2274_v27 }
 0x151   : > { %979 = vmatprep.subr.bf16.mxu0 %v2269_v26  ;;  %1020 = vmatprep.subr.bf16.mxu1 %v2279_v28 }
 0x154   : > { %980 = vmatpush1.bf16.msra.mxu0 %v2287_v30  ;;  %1021 = vmatpush1.bf16.msra.mxu1 %v2292_v31 }
 0x155   : > { %981 = vmatprep.subr.bf16.mxu0 %v2297_v32  ;;  %1022 = vmatprep.subr.bf16.mxu1 %v2300_v33 }
 0x158   : > { %982 = vmatpush1.bf16.msra.mxu0 %v2307_v34  ;;  %1023 = vmatpush1.bf16.msra.mxu1 %v2310_v35 }
 0x159   : > { %983 = vmatprep.subr.bf16.mxu0 %v2315_v36  ;;  %1024 = vmatprep.subr.bf16.mxu1 %v2318_v37 }
 0x15c   : > { %984 = vmatpush1.bf16.msra.mxu0 %v2328_v39  ;;  %1025 = vmatpush1.bf16.msra.mxu1 %v2331_v40 }
 0x15d   : > { %985 = vmatprep.subr.bf16.mxu0 %v2336_v41  ;;  %1026 = vmatprep.subr.bf16.mxu1 %v2339_v42 }
 0x160   : > { %986 = vmatpush1.bf16.msra.mxu0 %v2346_v43  ;;  %1027 = vmatpush1.bf16.msra.mxu1 %v2349_v44 }
 0x161   : > { %1093 = vmatprep.subr.bf16.mxu0 %v2205_v10  ;;  %1134 = vmatprep.subr.bf16.mxu1 %v2208_v11 }
 0x216   : > { %v883_v53 = vpop.f32.mrb[20].mxu0  ;;  %v924_v8 = vpop.f32.mrb[20].mxu1 }
 0x217   : > { %v931_v9 = vadd.f32 %v883_v53, %v844_v6  ;;  %v933_v20 = vadd.f32 %v924_v8, %v846_v7  ;;  %v885_v54 = vpop.f32.mrb[21].mxu0  ;;  %v926_v55 = vpop.f32.mrb[21].mxu1 }
 0x218   : > { %v932_v45 = vadd.f32 %v885_v54, %v845_v29  ;;  %v934_v46 = vadd.f32 %v926_v55, %v847_v38  ;;  %v887_v47 = vpop.f32.mrb[22].mxu0  ;;  %v928_v48 = vpop.f32.mrb[22].mxu1  ;;  %v968_v29 = vld [vmem:[%s965_s30 + $0x10] sm:$0xff] }
 0x219   : > { %v1857_v49 = vmul.f32 -1.442695, %v931_v9  ;;  %v888_v50 = vpop.f32.mrb[23].mxu0  ;;  %v929_v51 = vpop.f32.mrb[23].mxu1  ;;  %v969_v47 = vld [vmem:[%s965_s30 + $0x18] sm:$0xff] }
 0x21a   : > { %v1858_v56 = vmul.f32 -1.442695, %v932_v45  ;;  %v1859_v57 = vmul.f32 -1.442695, %v934_v46  ;;  %v967_v45 = vld [vmem:[%s965_s30 + $0x8] sm:$0xff] }
 0x21b   : > { %1997 = vpow2.f32 %v1857_v49 }
 0x21c   : > { %1999 = vpow2.f32 %v1858_v56 }
 0x21d   : > { %2001 = vpow2.f32 %v1859_v57 }
 0x21e   : > { %2003 = vtanh.f32 %v933_v20 }
 0x225   : > { %v1998_v58 = vpop.eup %1997 }
 0x226   : > { %v2000_v59 = vpop.eup %1999  ;;  %v938_v60 = vadd.f32 1.0, %v1998_v58 }
 0x227   : > { %v944_v61 = vadd.f32 1.0, %v2000_v59  ;;  %v2002_v62 = vpop.eup %2001 }
 0x228   : > { %2005 = vrcp.f32 %v938_v60  ;;  %v2004_v63 = vpop.eup %2003  ;;  %v951_v5 = vadd.f32 1.0, %v2002_v62 }
 0x229   : > { %2007 = vrcp.f32 %v944_v61 }
 0x22a   : > { %2009 = vrcp.f32 %v951_v5 }
 0x232   : > { %v2006_v1 = vpop.eup %2005 }
 0x233   : > { %v2008_v3 = vpop.eup %2007  ;;  %v955_v4 = vmul.f32 %v2006_v1, %v2004_v63 }
 0x234   : > { %v954_v52 = vmul.f32 %v2008_v3, %v2442_v2  ;;  %v2010_v53 = vpop.eup %2009  ;;  %v966_v2 = vld [vmem:[%s965_s30] sm:$0xff]  ;;  %s1571_s30 = sshra.s32 %s1890_s29, 3 }
 0x235   : > { %s1907_s5 = sshll.u32 %s1571_s30, 5 }
 0x236   : > { %v2482_v6 = vadd.f32 %v955_v4, %v954_v52  ;;  %s1575_s6 = scalar_lea.vmem [#allocation2], %s1907_s5 }
 0x238   : > { %2011 = vtanh.f32 %v2482_v6 }
 0x242   : > { %v2012_v7 = vpop.eup %2011 }
 0x243   : > { %v958_v8 = vmul.f32 %v2012_v7, %v2010_v53 }
 0x245   : > { %v970_v9 = vpack.c.bf16 %v958_v8, %v958_v8 }
 0x247   : > { %1004 = vmatmul.mubr.bf16.vlgmr.msra.gmra.mrb[24].mxu0 %v970_v9  ;;  %1045 = vmatmul.mubr.bf16.vlgmr.msra.gmra.mrb[24].mxu1 %v970_v9 }
 0x248   : > { %1094 = vmatpush1.bf16.msra.mxu0 %v2211_v12  ;;  %1135 = vmatpush1.bf16.msra.mxu1 %v2219_v14 }
 0x249   : > { %1095 = vmatprep.subr.bf16.mxu0 %v2216_v13  ;;  %1136 = vmatprep.subr.bf16.mxu1 %v2222_v15 }
 0x24a   : > { %1125 = vmatprep.mubr.bf16.mxu0 %v2149_v0  ;;  %1166 = vmatprep.mubr.bf16.mxu1 %v2149_v0 }
 0x24c   : > { %1096 = vmatpush1.bf16.msra.mxu0 %v2227_v16  ;;  %1137 = vmatpush1.bf16.msra.mxu1 %v2235_v18 }
 0x24d   : > { %1097 = vmatprep.subr.bf16.mxu0 %v2230_v17  ;;  %1138 = vmatprep.subr.bf16.mxu1 %v2240_v19 }
 0x250   : > { %1098 = vmatpush1.bf16.msra.mxu0 %v2248_v21  ;;  %1139 = vmatpush1.bf16.msra.mxu1 %v2253_v22 }
 0x251   : > { %1099 = vmatprep.subr.bf16.mxu0 %v2258_v23  ;;  %1140 = vmatprep.subr.bf16.mxu1 %v2261_v24 }
 0x254   : > { %1100 = vmatpush1.bf16.msra.mxu0 %v2266_v25  ;;  %1141 = vmatpush1.bf16.msra.mxu1 %v2274_v27 }
 0x255   : > { %1101 = vmatprep.subr.bf16.mxu0 %v2269_v26  ;;  %1142 = vmatprep.subr.bf16.mxu1 %v2279_v28 }
 0x258   : > { %1102 = vmatpush1.bf16.msra.mxu0 %v2287_v30  ;;  %1143 = vmatpush1.bf16.msra.mxu1 %v2292_v31 }
 0x259   : > { %1103 = vmatprep.subr.bf16.mxu0 %v2297_v32  ;;  %1144 = vmatprep.subr.bf16.mxu1 %v2300_v33 }
 0x25c   : > { %1104 = vmatpush1.bf16.msra.mxu0 %v2307_v34  ;;  %1145 = vmatpush1.bf16.msra.mxu1 %v2310_v35 }
 0x25d   : > { %1105 = vmatprep.subr.bf16.mxu0 %v2315_v36  ;;  %1146 = vmatprep.subr.bf16.mxu1 %v2318_v37 }
 0x260   : > { %1106 = vmatpush1.bf16.msra.mxu0 %v2328_v39  ;;  %1147 = vmatpush1.bf16.msra.mxu1 %v2331_v40 }
 0x261   : > { %1107 = vmatprep.subr.bf16.mxu0 %v2336_v41  ;;  %1148 = vmatprep.subr.bf16.mxu1 %v2339_v42 }
 0x264   : > { %1108 = vmatpush1.bf16.msra.mxu0 %v2346_v43  ;;  %1149 = vmatpush1.bf16.msra.mxu1 %v2349_v44 }
 0x265   : > { %1215 = vmatprep.subr.bf16.mxu0 %v2205_v10  ;;  %1256 = vmatprep.subr.bf16.mxu1 %v2208_v11 }
 0x31a   : > { %v1005_v20 = vpop.f32.mrb[24].mxu0  ;;  %v1046_v54 = vpop.f32.mrb[24].mxu1 }
 0x31b   : > { %v1053_v38 = vadd.f32 %v1005_v20, %v966_v2  ;;  %v1055_v55 = vadd.f32 %v1046_v54, %v968_v29  ;;  %v1007_v46 = vpop.f32.mrb[25].mxu0  ;;  %v1048_v48 = vpop.f32.mrb[25].mxu1 }
 0x31c   : > { %v1054_v49 = vadd.f32 %v1007_v46, %v967_v45  ;;  %v1056_v10 = vadd.f32 %v1048_v48, %v969_v47  ;;  %v1009_v50 = vpop.f32.mrb[26].mxu0  ;;  %v1050_v11 = vpop.f32.mrb[26].mxu1 }
 0x31d   : > { %v1863_v51 = vmul.f32 -1.442695, %v1053_v38  ;;  %v1010_v56 = vpop.f32.mrb[27].mxu0  ;;  %v1051_v57 = vpop.f32.mrb[27].mxu1 }
 0x31e   : > { %v1864_v58 = vmul.f32 -1.442695, %v1054_v49  ;;  %v1865_v59 = vmul.f32 -1.442695, %v1056_v10 }
 0x31f   : > { %2013 = vpow2.f32 %v1863_v51 }
 0x320   : > { %2015 = vpow2.f32 %v1864_v58 }
 0x321   : > { %2017 = vpow2.f32 %v1865_v59 }
 0x322   : > { %2019 = vtanh.f32 %v1055_v55 }
 0x329   : > { %v2014_v60 = vpop.eup %2013 }
 0x32a   : > { %v2016_v61 = vpop.eup %2015  ;;  %v1060_v62 = vadd.f32 1.0, %v2014_v60 }
 0x32b   : > { %v1066_v63 = vadd.f32 1.0, %v2016_v61  ;;  %v2018_v1 = vpop.eup %2017 }
 0x32c   : > { %2021 = vrcp.f32 %v1060_v62  ;;  %v2020_v3 = vpop.eup %2019  ;;  %v1073_v53 = vadd.f32 1.0, %v2018_v1  ;;  %v2576_v1 = vld [vmem:[%s2199_s25 + $0x8] ss:$16 sps:$4 sm:$0xff]  }
 0x32d   : > { %2023 = vrcp.f32 %v1066_v63  ;;  %v2572_v63 = vld [vmem:[%s2199_s25] ss:$16 sps:$4 sm:$0xff]  }
 0x32e   : > { %2025 = vrcp.f32 %v1073_v53  ;;  %v2598_v53 = vld [vmem:[%s2199_s25 + $0x44] ss:$16 sps:$4 sm:$0xff]  }
 0x336   : > { %v2022_v4 = vpop.eup %2021 }
 0x337   : > { %v2024_v5 = vpop.eup %2023  ;;  %v1077_v52 = vmul.f32 %v2022_v4, %v2020_v3  ;;  %v2580_v3 = vld [vmem:[%s2199_s25 + $0x24] ss:$16 sps:$4 sm:$0xff]   ;;  %v2584_v4 = vld [vmem:[%s2199_s25 + $0x2c] ss:$16 sps:$4 sm:$0xff]  }
 0x338   : > { %v1076_v7 = vmul.f32 %v2024_v5, %v2482_v6  ;;  %v2026_v9 = vpop.eup %2025  ;;  %v2590_v5 = vld [vmem:[%s2199_s25 + $0x20] ss:$16 sps:$4 sm:$0xff]  }
 0x33a   : > { %v2522_v8 = vadd.f32 %v1077_v52, %v1076_v7  ;;  %v2594_v52 = vld [vmem:[%s2199_s25 + $0x28] ss:$16 sps:$4 sm:$0xff]   ;;  %v2602_v7 = vld [vmem:[%s2199_s25 + $0x4c] ss:$16 sps:$4 sm:$0xff]  }
 0x33c   : > { %2027 = vtanh.f32 %v2522_v8 }
 0x346   : > { %v2028_v2 = vpop.eup %2027 }
 0x347   : > { %v1080_v20 = vmul.f32 %v2028_v2, %v2026_v9  ;;  %v2610_v9 = vld [vmem:[%s2199_s25 + $0x48] ss:$16 sps:$4 sm:$0xff]   ;;  %v2614_v2 = vld [vmem:[%s2199_s25 + $0x64] ss:$16 sps:$4 sm:$0xff]  }
 0x349   : > { %v1092_v29 = vpack.c.bf16 %v1080_v20, %v1080_v20  ;;  %v2618_v20 = vld [vmem:[%s2199_s25 + $0x6c] ss:$16 sps:$4 sm:$0xff]  }
 0x34b   : > { %1126 = vmatmul.mubr.bf16.vlgmr.msra.gmra.mrb[28].mxu0 %v1092_v29  ;;  %1167 = vmatmul.mubr.bf16.vlgmr.msra.gmra.mrb[28].mxu1 %v1092_v29  ;;  %v2622_v29 = vld [vmem:[%s2199_s25 + $0x60] ss:$16 sps:$4 sm:$0xff]  }
 0x34c   : > { %1216 = vmatpush1.bf16.msra.mxu0 %v2211_v12  ;;  %1257 = vmatpush1.bf16.msra.mxu1 %v2219_v14  ;;  %v2558_v12 = vld [vmem:[%s2199_s25 + $0x4] ss:$16 sps:$4 sm:$0xff]  }
 0x34d   : > { %1217 = vmatprep.subr.bf16.mxu0 %v2216_v13  ;;  %1258 = vmatprep.subr.bf16.mxu1 %v2222_v15  ;;  %v2562_v13 = vld [vmem:[%s2199_s25 + $0xc] ss:$16 sps:$4 sm:$0xff]   ;;  %v1088_v14 = vld [vmem:[%s1087_s9] sm:$0xff] }
 0x34e   : > { %1247 = vmatprep.mubr.bf16.mxu0 %v2149_v0  ;;  %1288 = vmatprep.mubr.bf16.mxu1 %v2149_v0 }
 0x350   : > { %1218 = vmatpush1.bf16.msra.mxu0 %v2227_v16  ;;  %1259 = vmatpush1.bf16.msra.mxu1 %v2235_v18  ;;  %v1090_v16 = vld [vmem:[%s1087_s9 + $0x10] sm:$0xff] }
 0x351   : > { %1219 = vmatprep.subr.bf16.mxu0 %v2230_v17  ;;  %1260 = vmatprep.subr.bf16.mxu1 %v2240_v19 }
 0x354   : > { %1220 = vmatpush1.bf16.msra.mxu0 %v2248_v21  ;;  %1261 = vmatpush1.bf16.msra.mxu1 %v2253_v22  ;;  %v1089_v21 = vld [vmem:[%s1087_s9 + $0x8] sm:$0xff] }
 0x355   : > { %1221 = vmatprep.subr.bf16.mxu0 %v2258_v23  ;;  %1262 = vmatprep.subr.bf16.mxu1 %v2261_v24  ;;  %v1091_v23 = vld [vmem:[%s1087_s9 + $0x18] sm:$0xff]  ;;  %s232_s9 = scalar_lea.vmem %s2789_s4, %s1795_s16 }
 0x358   : > { %1222 = vmatpush1.bf16.msra.mxu0 %v2266_v25  ;;  %1263 = vmatpush1.bf16.msra.mxu1 %v2274_v27 }
 0x359   : > { %1223 = vmatprep.subr.bf16.mxu0 %v2269_v26  ;;  %1264 = vmatprep.subr.bf16.mxu1 %v2279_v28 }
 0x35c   : > { %1224 = vmatpush1.bf16.msra.mxu0 %v2287_v30  ;;  %1265 = vmatpush1.bf16.msra.mxu1 %v2292_v31 }
 0x35d   : > { %1225 = vmatprep.subr.bf16.mxu0 %v2297_v32  ;;  %1266 = vmatprep.subr.bf16.mxu1 %v2300_v33 }
 0x360   : > { %1226 = vmatpush1.bf16.msra.mxu0 %v2307_v34  ;;  %1267 = vmatpush1.bf16.msra.mxu1 %v2310_v35 }
 0x361   : > { %1227 = vmatprep.subr.bf16.mxu0 %v2315_v36  ;;  %1268 = vmatprep.subr.bf16.mxu1 %v2318_v37 }
 0x364   : > { %1228 = vmatpush1.bf16.msra.mxu0 %v2328_v39  ;;  %1269 = vmatpush1.bf16.msra.mxu1 %v2331_v40 }
 0x365   : > { %1229 = vmatprep.subr.bf16.mxu0 %v2336_v41  ;;  %1270 = vmatprep.subr.bf16.mxu1 %v2339_v42 }
 0x368   : > { %1230 = vmatpush1.bf16.msra.mxu0 %v2346_v43  ;;  %1271 = vmatpush1.bf16.msra.mxu1 %v2349_v44 }
 0x369   : > { %1337 = vmatprep.subr.bf16.mxu0 %v2558_v12  ;;  %1378 = vmatprep.subr.bf16.mxu1 %v2562_v13 }
 0x41e   : > { %v1127_v15 = vpop.f32.mrb[28].mxu0  ;;  %v1168_v17 = vpop.f32.mrb[28].mxu1 }
 0x41f   : > { %v1175_v18 = vadd.f32 %v1127_v15, %v1088_v14  ;;  %v1177_v19 = vadd.f32 %v1168_v17, %v1090_v16  ;;  %v1129_v22 = vpop.f32.mrb[29].mxu0  ;;  %v1170_v24 = vpop.f32.mrb[29].mxu1  ;;  %v2626_v14 = vld [vmem:[%s2199_s25 + $0x68] ss:$16 sps:$4 sm:$0xff]   ;;  %v2630_v15 = vld [vmem:[%s2199_s25 + $0x84] ss:$16 sps:$4 sm:$0xff]  }
 0x420   : > { %v1176_v25 = vadd.f32 %v1129_v22, %v1089_v21  ;;  %v1178_v26 = vadd.f32 %v1170_v24, %v1091_v23  ;;  %v1131_v27 = vpop.f32.mrb[30].mxu0  ;;  %v1172_v28 = vpop.f32.mrb[30].mxu1  ;;  %v2634_v16 = vld [vmem:[%s2199_s25 + $0x8c] ss:$16 sps:$4 sm:$0xff]   ;;  %v2638_v17 = vld [vmem:[%s2199_s25 + $0x80] ss:$16 sps:$4 sm:$0xff]  }
 0x421   : > { %v1869_v30 = vmul.f32 -1.442695, %v1175_v18  ;;  %v1132_v6 = vpop.f32.mrb[31].mxu0  ;;  %v1173_v54 = vpop.f32.mrb[31].mxu1 }
 0x422   : > { %v1870_v38 = vmul.f32 -1.442695, %v1176_v25  ;;  %v1871_v55 = vmul.f32 -1.442695, %v1178_v26 }
 0x423   : > { %2029 = vpow2.f32 %v1869_v30 }
 0x424   : > { %2031 = vpow2.f32 %v1870_v38 }
 0x425   : > { %2033 = vpow2.f32 %v1871_v55 }
 0x426   : > { %2035 = vtanh.f32 %v1177_v19 }
 0x42d   : > { %v2030_v45 = vpop.eup %2029 }
 0x42e   : > { %v2032_v46 = vpop.eup %2031  ;;  %v1182_v47 = vadd.f32 1.0, %v2030_v45 }
 0x42f   : > { %v1188_v48 = vadd.f32 1.0, %v2032_v46  ;;  %v2034_v49 = vpop.eup %2033 }
 0x430   : > { %2037 = vrcp.f32 %v1182_v47  ;;  %v2036_v10 = vpop.eup %2035  ;;  %v1195_v56 = vadd.f32 1.0, %v2034_v49 }
 0x431   : > { %2039 = vrcp.f32 %v1188_v48 }
 0x432   : > { %2041 = vrcp.f32 %v1195_v56  ;;  %v2690_v56 = vld [vmem:[%s2199_s25 + $0xac] ss:$16 sps:$4 sm:$0xff]  }
 0x43a   : > { %v2038_v50 = vpop.eup %2037 }
 0x43b   : > { %v2040_v11 = vpop.eup %2039  ;;  %v1199_v51 = vmul.f32 %v2038_v50, %v2036_v10 }
 0x43c   : > { %v1198_v57 = vmul.f32 %v2040_v11, %v2522_v8  ;;  %v2042_v59 = vpop.eup %2041  ;;  %v2606_v8 = vld [vmem:[%s2199_s25 + $0x40] ss:$16 sps:$4 sm:$0xff]   ;;  %v2682_v11 = vld [vmem:[%s2199_s25 + $0x88] ss:$16 sps:$4 sm:$0xff]  }
 0x43e   : > { %v2568_v58 = vadd.f32 %v1199_v51, %v1198_v57  ;;  %v2686_v51 = vld [vmem:[%s2199_s25 + $0xa4] ss:$16 sps:$4 sm:$0xff]   ;;  %v2694_v57 = vld [vmem:[%s2199_s25 + $0xa0] ss:$16 sps:$4 sm:$0xff]  }
 0x440   : > { %2043 = vtanh.f32 %v2568_v58 }
 0x44a   : > { %v2044_v60 = vpop.eup %2043 }
 0x44b   : > { %v1202_v61 = vmul.f32 %v2044_v60, %v2042_v59  ;;  %v2702_v59 = vld [vmem:[%s2199_s25 + $0xc4] ss:$16 sps:$4 sm:$0xff]   ;;  %v2706_v60 = vld [vmem:[%s2199_s25 + $0xcc] ss:$16 sps:$4 sm:$0xff]  }
 0x44d   : > { %v1214_v62 = vpack.c.bf16 %v1202_v61, %v1202_v61  ;;  %v2710_v61 = vld [vmem:[%s2199_s25 + $0xc0] ss:$16 sps:$4 sm:$0xff]  }
 0x44f   : > { %1248 = vmatmul.mubr.bf16.vlgmr.msra.gmra.mrb[32].mxu0 %v1214_v62  ;;  %1289 = vmatmul.mubr.bf16.vlgmr.msra.gmra.mrb[32].mxu1 %v1214_v62  ;;  %v2714_v62 = vld [vmem:[%s2199_s25 + $0xc8] ss:$16 sps:$4 sm:$0xff]  }
 0x450   : > { %1338 = vmatpush1.bf16.msra.mxu0 %v2572_v63  ;;  %1379 = vmatpush1.bf16.msra.mxu1 %v2576_v1 }
 0x451   : > { %1339 = vmatprep.subr.bf16.mxu0 %v2580_v3  ;;  %1380 = vmatprep.subr.bf16.mxu1 %v2584_v4 }
 0x452   : > { %1369 = vmatprep.mubr.bf16.mxu0 %v2149_v0  ;;  %1410 = vmatprep.mubr.bf16.mxu1 %v2149_v0 }
 0x454   : > { %1340 = vmatpush1.bf16.msra.mxu0 %v2590_v5  ;;  %1381 = vmatpush1.bf16.msra.mxu1 %v2594_v52 }
 0x455   : > { %1341 = vmatprep.subr.bf16.mxu0 %v2598_v53  ;;  %1382 = vmatprep.subr.bf16.mxu1 %v2602_v7 }
 0x458   : > { %1342 = vmatpush1.bf16.msra.mxu0 %v2606_v8  ;;  %1383 = vmatpush1.bf16.msra.mxu1 %v2610_v9 }
 0x459   : > { %1343 = vmatprep.subr.bf16.mxu0 %v2614_v2  ;;  %1384 = vmatprep.subr.bf16.mxu1 %v2618_v20 }
 0x45c   : > { %1344 = vmatpush1.bf16.msra.mxu0 %v2622_v29  ;;  %1385 = vmatpush1.bf16.msra.mxu1 %v2626_v14 }
 0x45d   : > { %1345 = vmatprep.subr.bf16.mxu0 %v2630_v15  ;;  %1386 = vmatprep.subr.bf16.mxu1 %v2634_v16 }
 0x460   : > { %1346 = vmatpush1.bf16.msra.mxu0 %v2638_v17  ;;  %1387 = vmatpush1.bf16.msra.mxu1 %v2292_v31  ;;  %v1210_v31 = vld [vmem:[%s1209_s14] sm:$0xff] }
 0x461   : > { %1347 = vmatprep.subr.bf16.mxu0 %v2297_v32  ;;  %1388 = vmatprep.subr.bf16.mxu1 %v2300_v33  ;;  %v1212_v33 = vld [vmem:[%s1209_s14 + $0x10] sm:$0xff] }
 0x464   : > { %1348 = vmatpush1.bf16.msra.mxu0 %v2307_v34  ;;  %1389 = vmatpush1.bf16.msra.mxu1 %v2310_v35 }
 0x465   : > { %1349 = vmatprep.subr.bf16.mxu0 %v2315_v36  ;;  %1390 = vmatprep.subr.bf16.mxu1 %v2318_v37  ;;  %v1211_v37 = vld [vmem:[%s1209_s14 + $0x8] sm:$0xff] }
 0x468   : > { %1350 = vmatpush1.bf16.msra.mxu0 %v2328_v39  ;;  %1391 = vmatpush1.bf16.msra.mxu1 %v2331_v40  ;;  %v1213_v40 = vld [vmem:[%s1209_s14 + $0x18] sm:$0xff] }
 0x469   : > { %1351 = vmatprep.subr.bf16.mxu0 %v2336_v41  ;;  %1392 = vmatprep.subr.bf16.mxu1 %v2339_v42 }
 0x46c   : > { %1352 = vmatpush1.bf16.msra.mxu0 %v2346_v43  ;;  %1393 = vmatpush1.bf16.msra.mxu1 %v2349_v44 }
 0x46d   : > { %1459 = vmatprep.subr.bf16.mxu0 %v2558_v12  ;;  %1500 = vmatprep.subr.bf16.mxu1 %v2562_v13 }
 0x522   : > { %v1249_v32 = vpop.f32.mrb[32].mxu0  ;;  %v1290_v34 = vpop.f32.mrb[32].mxu1 }
 0x523   : > { %v1297_v35 = vadd.f32 %v1249_v32, %v1210_v31  ;;  %v1299_v36 = vadd.f32 %v1290_v34, %v1212_v33  ;;  %v1251_v39 = vpop.f32.mrb[33].mxu0  ;;  %v1292_v41 = vpop.f32.mrb[33].mxu1  ;;  %v2718_v31 = vld [vmem:[%s2199_s25 + $0xe4] ss:$16 sps:$4 sm:$0xff]   ;;  %v2722_v32 = vld [vmem:[%s2199_s25 + $0xec] ss:$16 sps:$4 sm:$0xff]  }
 0x524   : > { %v1298_v42 = vadd.f32 %v1251_v39, %v1211_v37  ;;  %v1300_v43 = vadd.f32 %v1292_v41, %v1213_v40  ;;  %v1253_v44 = vpop.f32.mrb[34].mxu0  ;;  %v1294_v18 = vpop.f32.mrb[34].mxu1  ;;  %v2726_v33 = vld [vmem:[%s2199_s25 + $0xe0] ss:$16 sps:$4 sm:$0xff]   ;;  %v2730_v34 = vld [vmem:[%s2199_s25 + $0xe8] ss:$16 sps:$4 sm:$0xff]  }
 0x525   : > { %v1875_v19 = vmul.f32 -1.442695, %v1297_v35  ;;  %v1254_v21 = vpop.f32.mrb[35].mxu0  ;;  %v1295_v22 = vpop.f32.mrb[35].mxu1  ;;  %v1332_v35 = vld [vmem:[%s1331_s22] sm:$0xff]  ;;  %v1334_v37 = vld [vmem:[%s1331_s22 + $0x10] sm:$0xff] }
 0x526   : > { %v1876_v23 = vmul.f32 -1.442695, %v1298_v42  ;;  %v1877_v24 = vmul.f32 -1.442695, %v1300_v43  ;;  %v1333_v42 = vld [vmem:[%s1331_s22 + $0x8] sm:$0xff]  ;;  %v1335_v44 = vld [vmem:[%s1331_s22 + $0x18] sm:$0xff] }
 0x527   : > { %2045 = vpow2.f32 %v1875_v19 }
 0x528   : > { %2047 = vpow2.f32 %v1876_v23 }
 0x529   : > { %2049 = vpow2.f32 %v1877_v24 }
 0x52a   : > { %2051 = vtanh.f32 %v1299_v36 }
 0x531   : > { %v2046_v25 = vpop.eup %2045 }
 0x532   : > { %v2048_v26 = vpop.eup %2047  ;;  %v1304_v27 = vadd.f32 1.0, %v2046_v25 }
 0x533   : > { %v1310_v28 = vadd.f32 1.0, %v2048_v26  ;;  %v2050_v30 = vpop.eup %2049 }
 0x534   : > { %2053 = vrcp.f32 %v1304_v27  ;;  %v2052_v6 = vpop.eup %2051  ;;  %v1317_v45 = vadd.f32 1.0, %v2050_v30 }
 0x535   : > { %2055 = vrcp.f32 %v1310_v28 }
 0x536   : > { %2057 = vrcp.f32 %v1317_v45 }
 0x53e   : > { %v2054_v54 = vpop.eup %2053 }
 0x53f   : > { %v2056_v38 = vpop.eup %2055  ;;  %v1321_v55 = vmul.f32 %v2054_v54, %v2052_v6 }
 0x540   : > { %v1320_v46 = vmul.f32 %v2056_v38, %v2568_v58  ;;  %v2058_v48 = vpop.eup %2057  ;;  %v2698_v58 = vld [vmem:[%s2199_s25 + $0xa8] ss:$16 sps:$4 sm:$0xff]   ;;  %s1447_s25 = scalar_select %p555_p4, 6, 1 }
 0x542   : > { %v2659_v47 = vadd.f32 %v1321_v55, %v1320_v46  ;;  %s1884_s23 = sshll.u32 %s1447_s25, 3 }
 0x543   : > { %s1449_s24 = sshra.s32 %s1884_s23, 3 }
 0x544   : > { %2059 = vtanh.f32 %v2659_v47  ;;  %s1906_s26 = sshll.u32 %s1449_s24, 5 }
 0x545   : > { %s1453_s27 = scalar_lea.vmem [#allocation2], %s1906_s26 }
 0x54e   : > { %v2060_v49 = vpop.eup %2059 }
 0x54f   : > { %v1324_v10 = vmul.f32 %v2060_v49, %v2058_v48 }
 0x551   : > { %v1336_v50 = vpack.c.bf16 %v1324_v10, %v1324_v10 }
 0x553   : > { %1370 = vmatmul.mubr.bf16.vlgmr.msra.gmra.mrb[36].mxu0 %v1336_v50  ;;  %1411 = vmatmul.mubr.bf16.vlgmr.msra.gmra.mrb[36].mxu1 %v1336_v50 }
 0x554   : > { %1460 = vmatpush1.bf16.msra.mxu0 %v2572_v63  ;;  %1501 = vmatpush1.bf16.msra.mxu1 %v2576_v1 }
 0x555   : > { %1461 = vmatprep.subr.bf16.mxu0 %v2580_v3  ;;  %1502 = vmatprep.subr.bf16.mxu1 %v2584_v4 }
 0x556   : > { %1491 = vmatprep.mubr.bf16.mxu0 %v2149_v0  ;;  %1532 = vmatprep.mubr.bf16.mxu1 %v2149_v0 }
 0x558   : > { %1462 = vmatpush1.bf16.msra.mxu0 %v2590_v5  ;;  %1503 = vmatpush1.bf16.msra.mxu1 %v2594_v52 }
 0x559   : > { %1463 = vmatprep.subr.bf16.mxu0 %v2598_v53  ;;  %1504 = vmatprep.subr.bf16.mxu1 %v2602_v7 }
 0x55c   : > { %1464 = vmatpush1.bf16.msra.mxu0 %v2606_v8  ;;  %1505 = vmatpush1.bf16.msra.mxu1 %v2610_v9 }
 0x55d   : > { %1465 = vmatprep.subr.bf16.mxu0 %v2614_v2  ;;  %1506 = vmatprep.subr.bf16.mxu1 %v2618_v20 }
 0x560   : > { %1466 = vmatpush1.bf16.msra.mxu0 %v2622_v29  ;;  %1507 = vmatpush1.bf16.msra.mxu1 %v2626_v14 }
 0x561   : > { %1467 = vmatprep.subr.bf16.mxu0 %v2630_v15  ;;  %1508 = vmatprep.subr.bf16.mxu1 %v2634_v16 }
 0x564   : > { %1468 = vmatpush1.bf16.msra.mxu0 %v2638_v17  ;;  %1509 = vmatpush1.bf16.msra.mxu1 %v2682_v11 }
 0x565   : > { %1469 = vmatprep.subr.bf16.mxu0 %v2686_v51  ;;  %1510 = vmatprep.subr.bf16.mxu1 %v2690_v56 }
 0x568   : > { %1470 = vmatpush1.bf16.msra.mxu0 %v2694_v57  ;;  %1511 = vmatpush1.bf16.msra.mxu1 %v2698_v58 }
 0x569   : > { %1471 = vmatprep.subr.bf16.mxu0 %v2702_v59  ;;  %1512 = vmatprep.subr.bf16.mxu1 %v2706_v60 }
 0x56c   : > { %1472 = vmatpush1.bf16.msra.mxu0 %v2710_v61  ;;  %1513 = vmatpush1.bf16.msra.mxu1 %v2714_v62 }
 0x56d   : > { %1473 = vmatprep.subr.bf16.mxu0 %v2718_v31  ;;  %1514 = vmatprep.subr.bf16.mxu1 %v2722_v32 }
 0x570   : > { %1474 = vmatpush1.bf16.msra.mxu0 %v2726_v33  ;;  %1515 = vmatpush1.bf16.msra.mxu1 %v2730_v34 }
 0x571   : > { %1581 = vmatprep.subr.bf16.mxu0 %v2558_v12  ;;  %1622 = vmatprep.subr.bf16.mxu1 %v2562_v13 }
 0x626   : > { %v1371_v36 = vpop.f32.mrb[36].mxu0  ;;  %v1412_v39 = vpop.f32.mrb[36].mxu1 }
 0x627   : > { %v1419_v40 = vadd.f32 %v1371_v36, %v1332_v35  ;;  %v1421_v41 = vadd.f32 %v1412_v39, %v1334_v37  ;;  %v1373_v43 = vpop.f32.mrb[37].mxu0  ;;  %v1414_v18 = vpop.f32.mrb[37].mxu1 }
 0x628   : > { %v1420_v19 = vadd.f32 %v1373_v43, %v1333_v42  ;;  %v1422_v12 = vadd.f32 %v1414_v18, %v1335_v44  ;;  %v1375_v21 = vpop.f32.mrb[38].mxu0  ;;  %v1416_v13 = vpop.f32.mrb[38].mxu1  ;;  %v1576_v42 = vld [vmem:[%s1575_s6] sm:$0xff]  ;;  %v1578_v44 = vld [vmem:[%s1575_s6 + $0x10] sm:$0xff] }
 0x629   : > { %v1881_v22 = vmul.f32 -1.442695, %v1419_v40  ;;  %v1376_v23 = vpop.f32.mrb[39].mxu0  ;;  %v1417_v24 = vpop.f32.mrb[39].mxu1  ;;  %v1577_v21 = vld [vmem:[%s1575_s6 + $0x8] sm:$0xff] }
 0x62a   : > { %v1882_v25 = vmul.f32 -1.442695, %v1420_v19  ;;  %v1883_v26 = vmul.f32 -1.442695, %v1422_v12 }
 0x62b   : > { %2061 = vpow2.f32 %v1881_v22  ;;  %v1579_v22 = vld [vmem:[%s1575_s6 + $0x18] sm:$0xff] }
 0x62c   : > { %2063 = vpow2.f32 %v1882_v25 }
 0x62d   : > { %2065 = vpow2.f32 %v1883_v26 }
 0x62e   : > { %2067 = vtanh.f32 %v1421_v41 }
 0x635   : > { %v2062_v27 = vpop.eup %2061 }
 0x636   : > { %v2064_v28 = vpop.eup %2063  ;;  %v1426_v30 = vadd.f32 1.0, %v2062_v27 }
 0x637   : > { %v1432_v6 = vadd.f32 1.0, %v2064_v28  ;;  %v2066_v54 = vpop.eup %2065 }
 0x638   : > { %2069 = vrcp.f32 %v1426_v30  ;;  %v2068_v38 = vpop.eup %2067  ;;  %v1439_v48 = vadd.f32 1.0, %v2066_v54 }
 0x639   : > { %2071 = vrcp.f32 %v1432_v6 }
 0x63a   : > { %2073 = vrcp.f32 %v1439_v48 }
 0x642   : > { %v2070_v55 = vpop.eup %2069 }
 0x643   : > { %v2072_v45 = vpop.eup %2071  ;;  %v1443_v46 = vmul.f32 %v2070_v55, %v2068_v38 }
 0x644   : > { %v1442_v49 = vmul.f32 %v2072_v45, %v2659_v47  ;;  %v2074_v50 = vpop.eup %2073 }
 0x646   : > { %v2738_v10 = vadd.f32 %v1443_v46, %v1442_v49 }
 0x648   : > { %2075 = vtanh.f32 %v2738_v10 }
 0x652   : > { %v2076_v35 = vpop.eup %2075 }
 0x653   : > { %v1446_v36 = vmul.f32 %v2076_v35, %v2074_v50 }
 0x655   : > { %v1458_v37 = vpack.c.bf16 %v1446_v36, %v1446_v36 }
 0x657   : > { %1492 = vmatmul.mubr.bf16.vlgmr.msra.gmra.mrb[40].mxu0 %v1458_v37  ;;  %1533 = vmatmul.mubr.bf16.vlgmr.msra.gmra.mrb[40].mxu1 %v1458_v37 }
 0x658   : > { %1582 = vmatpush1.bf16.msra.mxu0 %v2572_v63  ;;  %1623 = vmatpush1.bf16.msra.mxu1 %v2576_v1  ;;  %v1456_v1 = vld [vmem:[%s1453_s27 + $0x10] sm:$0xff] }
 0x659   : > { %1583 = vmatprep.subr.bf16.mxu0 %v2580_v3  ;;  %1624 = vmatprep.subr.bf16.mxu1 %v2584_v4 }
 0x65a   : > { %1613 = vmatprep.mubr.bf16.mxu0 %v2149_v0  ;;  %1654 = vmatprep.mubr.bf16.mxu1 %v2149_v0  ;;  %v1454_v0 = vld [vmem:[%s1453_s27] sm:$0xff] }
 0x65c   : > { %1584 = vmatpush1.bf16.msra.mxu0 %v2590_v5  ;;  %1625 = vmatpush1.bf16.msra.mxu1 %v2594_v52  ;;  %v1455_v52 = vld [vmem:[%s1453_s27 + $0x8] sm:$0xff] }
 0x65d   : > { %1585 = vmatprep.subr.bf16.mxu0 %v2598_v53  ;;  %1626 = vmatprep.subr.bf16.mxu1 %v2602_v7  ;;  %v1457_v7 = vld [vmem:[%s1453_s27 + $0x18] sm:$0xff] }
 0x660   : > { %1586 = vmatpush1.bf16.msra.mxu0 %v2606_v8  ;;  %1627 = vmatpush1.bf16.msra.mxu1 %v2610_v9 }
 0x661   : > { %1587 = vmatprep.subr.bf16.mxu0 %v2614_v2  ;;  %1628 = vmatprep.subr.bf16.mxu1 %v2618_v20 }
 0x664   : > { %1588 = vmatpush1.bf16.msra.mxu0 %v2622_v29  ;;  %1629 = vmatpush1.bf16.msra.mxu1 %v2626_v14 }
 0x665   : > { %1589 = vmatprep.subr.bf16.mxu0 %v2630_v15  ;;  %1630 = vmatprep.subr.bf16.mxu1 %v2634_v16 }
 0x668   : > { %1590 = vmatpush1.bf16.msra.mxu0 %v2638_v17  ;;  %1631 = vmatpush1.bf16.msra.mxu1 %v2682_v11 }
 0x669   : > { %1591 = vmatprep.subr.bf16.mxu0 %v2686_v51  ;;  %1632 = vmatprep.subr.bf16.mxu1 %v2690_v56 }
 0x66c   : > { %1592 = vmatpush1.bf16.msra.mxu0 %v2694_v57  ;;  %1633 = vmatpush1.bf16.msra.mxu1 %v2698_v58 }
 0x66d   : > { %1593 = vmatprep.subr.bf16.mxu0 %v2702_v59  ;;  %1634 = vmatprep.subr.bf16.mxu1 %v2706_v60 }
 0x670   : > { %1594 = vmatpush1.bf16.msra.mxu0 %v2710_v61  ;;  %1635 = vmatpush1.bf16.msra.mxu1 %v2714_v62 }
 0x671   : > { %1595 = vmatprep.subr.bf16.mxu0 %v2718_v31  ;;  %1636 = vmatprep.subr.bf16.mxu1 %v2722_v32 }
 0x674   : > { %1596 = vmatpush1.bf16.msra.mxu0 %v2726_v33  ;;  %1637 = vmatpush1.bf16.msra.mxu1 %v2730_v34 }
 0x72a   : > { %v1493_v63 = vpop.f32.mrb[40].mxu0  ;;  %v1534_v3 = vpop.f32.mrb[40].mxu1 }
 0x72b   : > { %v1541_v4 = vadd.f32 %v1493_v63, %v1454_v0  ;;  %v1543_v5 = vadd.f32 %v1534_v3, %v1456_v1  ;;  %v1495_v53 = vpop.f32.mrb[41].mxu0  ;;  %v1536_v8 = vpop.f32.mrb[41].mxu1 }
 0x72c   : > { %v1542_v9 = vadd.f32 %v1495_v53, %v1455_v52  ;;  %v1544_v2 = vadd.f32 %v1536_v8, %v1457_v7  ;;  %v1497_v20 = vpop.f32.mrb[42].mxu0  ;;  %v1538_v29 = vpop.f32.mrb[42].mxu1 }
 0x72d   : > { %v1887_v14 = vmul.f32 -1.442695, %v1541_v4  ;;  %v1498_v15 = vpop.f32.mrb[43].mxu0  ;;  %v1539_v16 = vpop.f32.mrb[43].mxu1 }
 0x72e   : > { %v1888_v17 = vmul.f32 -1.442695, %v1542_v9  ;;  %v1889_v47 = vmul.f32 -1.442695, %v1544_v2 }
 0x72f   : > { %2077 = vpow2.f32 %v1887_v14 }
 0x730   : > { %2079 = vpow2.f32 %v1888_v17 }
 0x731   : > { %2081 = vpow2.f32 %v1889_v47 }
 0x732   : > { %2083 = vtanh.f32 %v1543_v5 }
 0x739   : > { %v2078_v11 = vpop.eup %2077 }
 0x73a   : > { %v2080_v51 = vpop.eup %2079  ;;  %v1548_v56 = vadd.f32 1.0, %v2078_v11 }
 0x73b   : > { %v1554_v57 = vadd.f32 1.0, %v2080_v51  ;;  %v2082_v58 = vpop.eup %2081 }
 0x73c   : > { %2085 = vrcp.f32 %v1548_v56  ;;  %v2084_v59 = vpop.eup %2083  ;;  %v1561_v31 = vadd.f32 1.0, %v2082_v58 }
 0x73d   : > { %2087 = vrcp.f32 %v1554_v57 }
 0x73e   : > { %2089 = vrcp.f32 %v1561_v31 }
 0x746   : > { %v2086_v60 = vpop.eup %2085 }
 0x747   : > { %v2088_v61 = vpop.eup %2087  ;;  %v1565_v62 = vmul.f32 %v2086_v60, %v2084_v59 }
 0x748   : > { %v1564_v32 = vmul.f32 %v2088_v61, %v2738_v10  ;;  %v2090_v34 = vpop.eup %2089 }
 0x74a   : > { %v1566_v33 = vadd.f32 %v1565_v62, %v1564_v32 }
 0x74c   : > { %2091 = vtanh.f32 %v1566_v33 }
 0x756   : > { %v2092_v39 = vpop.eup %2091 }
 0x757   : > { %v1568_v40 = vmul.f32 %v2092_v39, %v2090_v34 }
 0x759   : > { %v1580_v41 = vpack.c.bf16 %v1568_v40, %v1568_v40 }
 0x75b   : > { %1614 = vmatmul.mubr.bf16.vlgmr.msra.gmra.mrb[44].mxu0 %v1580_v41  ;;  %1655 = vmatmul.mubr.bf16.vlgmr.msra.gmra.mrb[44].mxu1 %v1580_v41 }
 0x82e   : > { %v1615_v43 = vpop.f32.mrb[44].mxu0  ;;  %v1656_v18 = vpop.f32.mrb[44].mxu1 }
 0x82f   : > { %v1663_v19 = vadd.f32 %v1615_v43, %v1576_v42  ;;  %v1665_v12 = vadd.f32 %v1656_v18, %v1578_v44  ;;  %v1617_v13 = vpop.f32.mrb[45].mxu0  ;;  %v1658_v23 = vpop.f32.mrb[45].mxu1 }
 0x830   : > { %v1664_v24 = vadd.f32 %v1617_v13, %v1577_v21  ;;  %v1666_v25 = vadd.f32 %v1658_v23, %v1579_v22  ;;  %v1619_v26 = vpop.f32.mrb[46].mxu0  ;;  %v1660_v27 = vpop.f32.mrb[46].mxu1 }
 0x831   : > { %v1893_v28 = vmul.f32 -1.442695, %v1663_v19  ;;  %v1620_v30 = vpop.f32.mrb[47].mxu0  ;;  %v1661_v6 = vpop.f32.mrb[47].mxu1 }
 0x832   : > { %v1894_v54 = vmul.f32 -1.442695, %v1664_v24  ;;  %v1895_v38 = vmul.f32 -1.442695, %v1666_v25 }
 0x833   : > { %2093 = vpow2.f32 %v1893_v28 }
 0x834   : > { %2095 = vpow2.f32 %v1894_v54 }
 0x835   : > { %2097 = vpow2.f32 %v1895_v38 }
 0x836   : > { %2099 = vtanh.f32 %v1665_v12 }
 0x83d   : > { %v2094_v55 = vpop.eup %2093 }
 0x83e   : > { %v2096_v45 = vpop.eup %2095  ;;  %v1670_v46 = vadd.f32 1.0, %v2094_v55 }
 0x83f   : > { %v1676_v48 = vadd.f32 1.0, %v2096_v45  ;;  %v2098_v49 = vpop.eup %2097 }
 0x840   : > { %2101 = vrcp.f32 %v1670_v46  ;;  %v2100_v10 = vpop.eup %2099  ;;  %v1683_v37 = vadd.f32 1.0, %v2098_v49 }
 0x841   : > { %2103 = vrcp.f32 %v1676_v48 }
 0x842   : > { %2105 = vrcp.f32 %v1683_v37 }
 0x84a   : > { %v2102_v50 = vpop.eup %2101 }
 0x84b   : > { %v2104_v35 = vpop.eup %2103  ;;  %v1687_v36 = vmul.f32 %v2102_v50, %v2100_v10 }
 0x84c   : > { %v1686_v0 = vmul.f32 %v2104_v35, %v1566_v33  ;;  %v2106_v1 = vpop.eup %2105 }
 0x84e   : > { %v1688_v63 = vadd.f32 %v1687_v36, %v1686_v0 }
 0x850   : > { %2107 = vtanh.f32 %v1688_v63 }
 0x85a   : > { %v2108_v3 = vpop.eup %2107 }
 0x85b   : > { %v1690_v4 = vmul.f32 %v2108_v3, %v2106_v1 }
 0x85d   : > { %1691 = vst [vmem:[%s232_s9] sm:$0xff] %v1690_v4 }
 0x85e PF: > { %s14_s15 = sadd.s32 1, %s2147_s15  }
 0x85f   : > { %p11_p5 = scmp.ge.s32.totalorder %s14_s15, 4  }
 0x861   :  { %13 = sbr.rel (!%p11_p5) target bundleno = 1 (0x1), region = 80 }

</bundles_post_ra>
